<compile_context>
chip_gen: v7x
topology: tpu7x:2x2x1
jax: 0.10.0
libtpu: 0.0.40
codegen_flags: <defaults>
</compile_context>

<pallas_src>
import functools
import math

import jax
import jax.numpy as jnp
from jax.experimental import pallas as pl
from jax.experimental.pallas import tpu as pltpu

VMEM_SPEC = pl.BlockSpec(memory_space=pltpu.MemorySpace.VMEM)


def _round_up(x, m):
    return ((x + m - 1) // m) * m


def _pick_tile(total, cap, align):
    """Largest multiple of `align` that divides `total` and is <= cap (total % align == 0)."""
    t = (min(cap, total) // align) * align
    while t > align:
        if total % t == 0:
            return t
        t -= align
    return align


def _pick_hw_tile(hw, cap=2048):
    """HW tile for the norm kernels: full HW if small / not 8-aligned, else a divisor <= cap."""
    if hw <= cap or hw % 8 != 0:
        return hw
    t = cap - (cap % 8)
    while t >= 8:
        if hw % t == 0:
            return t
        t -= 8
    return hw


# ----------------------------------------------------------------------------
# Kernel 1: grid-tiled matmul + bias + activation (M/N parallel, K accumulating)
# ----------------------------------------------------------------------------
def _mm_kernel(a_ref, w_ref, b_ref, o_ref, acc_ref, *, act):
    """acc[i,j] += a[i,k] @ w[k,j]; on last k step: o = act(acc + bias).
    act: 0=none, 1=relu, 2=tanh."""
    kk = pl.program_id(2)

    @pl.when(kk == 0)
    def _():
        acc_ref[...] = jnp.zeros_like(acc_ref)

    acc_ref[...] += jnp.dot(a_ref[...], w_ref[...],
                            preferred_element_type=jnp.float32)

    @pl.when(kk == pl.num_programs(2) - 1)
    def _():
        y = acc_ref[...] + b_ref[...]
        if act == 1:
            y = jnp.maximum(y, 0.0)
        elif act == 2:
            y = jnp.tanh(y)
        o_ref[...] = y.astype(o_ref.dtype)


def matmul_bias_act(a, w, b, act=0, out_dtype=jnp.bfloat16):
    """a:(M,K), w:(K,N), b:(N,) -> (M,N) = act(a @ w + b), bf16 MXU operands, f32 acc.

    grid=(M_tiles, N_tiles, K_tiles) with K last; acc scratch is (tm, tn) f32 so the
    VMEM footprint stays ~2 MiB regardless of layer size.  tk divides the 128-aligned K
    (no extra K zero-pad of the im2col matrix); small non-aligned K uses one full-K tile.
    """
    m, k = a.shape
    n = w.shape[1]

    npad = _round_up(n, 128)
    tn = _pick_tile(npad, 256, 128)

    kp0 = _round_up(k, 128)
    if k == kp0:
        kpad = k
        tk = _pick_tile(kpad, 512, 128)
    elif k <= 4096:
        kpad = k            # single full-K tile: avoids a zero-pad copy of A
        tk = k
    else:
        kpad = kp0
        tk = _pick_tile(kpad, 512, 128)

    if m >= 256:
        tm = 256
        mpad = _round_up(m, tm)
    else:
        tm = _round_up(m, 8)
        mpad = tm

    a_bf = a.astype(jnp.bfloat16)
    w_bf = w.astype(jnp.bfloat16)
    if (mpad - m) or (kpad - k):
        a_bf = jnp.pad(a_bf, ((0, mpad - m), (0, kpad - k)))
    if (kpad - k) or (npad - n):
        w_bf = jnp.pad(w_bf, ((0, kpad - k), (0, npad - n)))
    b2 = b.astype(jnp.float32).reshape(1, n)
    if npad - n:
        b2 = jnp.pad(b2, ((0, 0), (0, npad - n)))

    out = pl.pallas_call(
        functools.partial(_mm_kernel, act=act),
        out_shape=jax.ShapeDtypeStruct((mpad, npad), out_dtype),
        grid_spec=pltpu.PrefetchScalarGridSpec(
            num_scalar_prefetch=0,
            grid=(mpad // tm, npad // tn, kpad // tk),
            in_specs=[
                pl.BlockSpec((tm, tk), lambda i, j, kk: (i, kk)),
                pl.BlockSpec((tk, tn), lambda i, j, kk: (kk, j)),
                pl.BlockSpec((1, tn), lambda i, j, kk: (0, j)),
            ],
            out_specs=pl.BlockSpec((tm, tn), lambda i, j, kk: (i, j)),
            scratch_shapes=[pltpu.VMEM((tm, tn), jnp.float32)],
        ),
        compiler_params=pltpu.CompilerParams(
            dimension_semantics=("parallel", "parallel", "arbitrary")),
    )(a_bf, w_bf, b2)
    if mpad == m and npad == n:
        return out
    return out[:m, :n]


# ----------------------------------------------------------------------------
# Kernel 2/3: two-pass normalization on (B, H*W, C) slabs, HW-tiled
#   pass 1: per-(b, c) sum / sumsq accumulation
#   pass 2: y = x * scale + shift (+ skip) (+ relu)      (scale/shift from jnp on (B, C))
# ----------------------------------------------------------------------------
def _moments_kernel(x_ref, s_ref, q_ref):
    @pl.when(pl.program_id(1) == 0)
    def _():
        s_ref[...] = jnp.zeros_like(s_ref)
        q_ref[...] = jnp.zeros_like(q_ref)

    x = x_ref[0].astype(jnp.float32)                       # (thw, C)
    s_ref[0] += jnp.sum(x, axis=0, keepdims=True)          # (1, C)
    q_ref[0] += jnp.sum(x * x, axis=0, keepdims=True)      # (1, C)


def _moments(x2):
    """x2: (B, HW, C) -> per-(b, c) sum and sumsq, both (B, C) f32."""
    b, hw, c = x2.shape
    thw = _pick_hw_tile(hw)
    s, q = pl.pallas_call(
        _moments_kernel,
        out_shape=(jax.ShapeDtypeStruct((b, 1, c), jnp.float32),
                   jax.ShapeDtypeStruct((b, 1, c), jnp.float32)),
        grid=(b, hw // thw),
        in_specs=[pl.BlockSpec((1, thw, c), lambda i, j: (i, j, 0))],
        out_specs=(pl.BlockSpec((1, 1, c), lambda i, j: (i, 0, 0)),
                   pl.BlockSpec((1, 1, c), lambda i, j: (i, 0, 0))),
        compiler_params=pltpu.CompilerParams(
            dimension_semantics=("parallel", "arbitrary")),
    )(x2)
    return s[:, 0, :], q[:, 0, :]


def _affine_kernel(x_ref, sc_ref, sh_ref, o_ref, *, relu):
    y = x_ref[0].astype(jnp.float32) * sc_ref[0] + sh_ref[0]
    if relu:
        y = jnp.maximum(y, 0.0)
    o_ref[0] = y.astype(o_ref.dtype)


def _affine_skip_kernel(x_ref, skip_ref, sc_ref, sh_ref, o_ref, *, relu):
    y = x_ref[0].astype(jnp.float32) * sc_ref[0] + sh_ref[0]
    if relu:
        y = jnp.maximum(y, 0.0)
    y = y + skip_ref[0].astype(jnp.float32)                 # fused residual add
    o_ref[0] = y.astype(o_ref.dtype)


def _apply_affine(x2, scale_bc, shift_bc, relu, skip2=None):
    b, hw, c = x2.shape
    thw = _pick_hw_tile(hw)
    sc = scale_bc.reshape(b, 1, c).astype(jnp.float32)
    sh = shift_bc.reshape(b, 1, c).astype(jnp.float32)
    xspec = pl.BlockSpec((1, thw, c), lambda i, j: (i, j, 0))
    pspec = pl.BlockSpec((1, 1, c), lambda i, j: (i, 0, 0))
    if skip2 is None:
        kern = functools.partial(_affine_kernel, relu=relu)
        in_specs = [xspec, pspec, pspec]
        args = (x2, sc, sh)
    else:
        kern = functools.partial(_affine_skip_kernel, relu=relu)
        in_specs = [xspec, xspec, pspec, pspec]
        args = (x2, skip2, sc, sh)
    return pl.pallas_call(
        kern,
        out_shape=jax.ShapeDtypeStruct((b, hw, c), x2.dtype),
        grid=(b, hw // thw),
        in_specs=in_specs,
        out_specs=xspec,
        compiler_params=pltpu.CompilerParams(
            dimension_semantics=("parallel", "parallel")),
    )(*args)


def instance_affine_norm(x, gamma_bc, beta_bc, relu, skip=None, eps=1e-5):
    """x: NHWC (bf16); gamma_bc/beta_bc: (B, C).  InstanceNorm2d / AdaIN semantics
    (biased var, eps inside rsqrt).  Optional fused residual add of `skip`."""
    b, h, w, c = x.shape
    hw = h * w
    x2 = x.reshape(b, hw, c)
    s, q = _moments(x2)
    mu = s / hw
    var = jnp.maximum(q / hw - mu * mu, 0.0)
    scale = gamma_bc.astype(jnp.float32) * jax.lax.rsqrt(var + eps)
    shift = beta_bc.astype(jnp.float32) - mu * scale
    skip2 = skip.reshape(b, hw, c) if skip is not None else None
    return _apply_affine(x2, scale, shift, relu, skip2).reshape(b, h, w, c)


def instance_norm(x, relu, skip=None):
    b, _, _, c = x.shape
    return instance_affine_norm(x, jnp.ones((b, c), jnp.float32),
                                jnp.zeros((b, c), jnp.float32), relu, skip)


def layer_norm(x, gamma, beta, relu, eps=1e-5):
    """MUNIT LayerNorm: per-sample stats over C*H*W, unbiased std, eps added to std,
    per-channel affine."""
    b, h, w, c = x.shape
    hw = h * w
    x2 = x.reshape(b, hw, c)
    s, q = _moments(x2)
    n = hw * c
    tot = jnp.sum(s, axis=1)
    totq = jnp.sum(q, axis=1)
    mu = tot / n
    var = jnp.maximum((totq - n * mu * mu) / (n - 1), 0.0)
    denom = jnp.sqrt(var) + eps
    scale = gamma.astype(jnp.float32)[None, :] / denom[:, None]
    shift = beta.astype(jnp.float32)[None, :] - mu[:, None] * scale
    return _apply_affine(x2, scale, shift, relu).reshape(b, h, w, c)


# ----------------------------------------------------------------------------
# Kernel 4: fused 3-layer style MLP -> AdaIN params (single launch, lane-dense)
# ----------------------------------------------------------------------------
def _mlp_kernel(s_ref, w0_ref, b0_ref, w1_ref, b1_ref, w2_ref, b2_ref, o_ref):
    h = jnp.dot(s_ref[...], w0_ref[...], preferred_element_type=jnp.float32) + b0_ref[...]
    h = jnp.maximum(h, 0.0)
    h = jnp.dot(h.astype(jnp.bfloat16), w1_ref[...],
                preferred_element_type=jnp.float32) + b1_ref[...]
    h = jnp.maximum(h, 0.0)
    o_ref[...] = jnp.dot(h.astype(jnp.bfloat16), w2_ref[...],
                         preferred_element_type=jnp.float32) + b2_ref[...]


def _pad2(w, r, c):
    pr, pc = r - w.shape[0], c - w.shape[1]
    if pr or pc:
        return jnp.pad(w, ((0, pr), (0, pc)))
    return w


def _pad_row(b, n):
    b2 = b.astype(jnp.float32).reshape(1, -1)
    pc = n - b2.shape[1]
    if pc:
        return jnp.pad(b2, ((0, 0), (0, pc)))
    return b2


def mlp_adain(mlp_params, style):
    """style: (B, style_dim) -> AdaIN params (B, num_adain).  One fused pallas_call;
    hidden and output widths are zero-padded to multiples of 128 (lane-dense stores;
    relu(0)=0 keeps padded lanes inert)."""
    bsz = style.shape[0]
    p0, p1, p2 = mlp_params
    h0, h1, nout = p0["w"].shape[1], p1["w"].shape[1], p2["w"].shape[1]
    h0p, h1p, nop = _round_up(h0, 128), _round_up(h1, 128), _round_up(nout, 128)
    out = pl.pallas_call(
        _mlp_kernel,
        out_shape=jax.ShapeDtypeStruct((bsz, nop), jnp.float32),
        in_specs=[VMEM_SPEC] * 7,
        out_specs=VMEM_SPEC,
    )(style.astype(jnp.bfloat16),
      _pad2(p0["w"], p0["w"].shape[0], h0p), _pad_row(p0["b"], h0p),
      _pad2(p1["w"], h0p, h1p), _pad_row(p1["b"], h1p),
      _pad2(p2["w"], h1p, nop), _pad_row(p2["b"], nop))
    return out[:, :nout] if nop != nout else out


# ----------------------------------------------------------------------------
# Conv via bf16 im2col + grid-tiled Pallas matmul (reflect padding, NHWC)
# ----------------------------------------------------------------------------
def conv2d(x, p, kh, kw, stride, pad, act=0, out_dtype=jnp.bfloat16):
    # TODO(synk): eliminate the HBM im2col entirely by folding the kh*kw taps into the
    #             matmul's K reduction grid axis (element-offset index_map over a
    #             reflect-padded NHWC input); kept here as bf16 im2col (half the bytes).
    xb = x.astype(jnp.bfloat16)
    if pad > 0:
        xb = jnp.pad(xb, ((0, 0), (pad, pad), (pad, pad), (0, 0)), mode="reflect")
    b, h, w, c = xb.shape
    oh = (h - kh) // stride + 1
    ow = (w - kw) // stride + 1
    cols = []
    for i in range(kh):
        for j in range(kw):
            cols.append(
                xb[:, i : i + stride * (oh - 1) + 1 : stride,
                       j : j + stride * (ow - 1) + 1 : stride, :]
            )
    col = jnp.concatenate(cols, axis=-1).reshape(b * oh * ow, kh * kw * c)
    y = matmul_bias_act(col, p["w"], p["b"], act=act, out_dtype=out_dtype)
    return y.reshape(b, oh, ow, -1)


def upsample2x(x):
    # TODO(synk): fold nearest-upsample into the following 5x5 conv's index_map to avoid
    #             materializing the 4x larger intermediate (repeat stays in bf16 here).
    return jnp.repeat(jnp.repeat(x, 2, axis=1), 2, axis=2)


# ----------------------------------------------------------------------------
# Parameter initialization (deterministic, synthetic).  Weights in bf16 for the MXU;
# biases and norm affines in f32.
# ----------------------------------------------------------------------------
class KeyGen:
    def __init__(self, key):
        self._key = key

    def __call__(self):
        self._key, sub = jax.random.split(self._key)
        return sub


def conv_init(kg, kh, kw, cin, cout):
    fan = kh * kw * cin
    w = (jax.random.normal(kg(), (fan, cout), jnp.float32)
         * (1.0 / math.sqrt(fan))).astype(jnp.bfloat16)
    b = jax.random.normal(kg(), (cout,), jnp.float32) * 0.01
    return {"w": w, "b": b}


def linear_init(kg, cin, cout):
    w = (jax.random.normal(kg(), (cin, cout), jnp.float32)
         * (1.0 / math.sqrt(cin))).astype(jnp.bfloat16)
    b = jax.random.normal(kg(), (cout,), jnp.float32) * 0.01
    return {"w": w, "b": b}


def init_gen_params(kg, input_dim, dim, style_dim, n_downsample, n_res, mlp_dim):
    p = {}
    # --- content encoder ---
    p["ce_conv0"] = conv_init(kg, 7, 7, input_dim, dim)
    d = dim
    p["ce_down"] = []
    for _ in range(n_downsample):
        p["ce_down"].append(conv_init(kg, 4, 4, d, 2 * d))
        d *= 2
    p["ce_res"] = [(conv_init(kg, 3, 3, d, d), conv_init(kg, 3, 3, d, d))
                   for _ in range(n_res)]
    content_dim = d
    # --- style encoder (MUNIT uses 4 fixed downsamples) ---
    p["se_conv0"] = conv_init(kg, 7, 7, input_dim, dim)
    sd = dim
    p["se_down"] = []
    for _ in range(2):
        p["se_down"].append(conv_init(kg, 4, 4, sd, 2 * sd))
        sd *= 2
    for _ in range(2):
        p["se_down"].append(conv_init(kg, 4, 4, sd, sd))
    p["se_out"] = linear_init(kg, sd, style_dim)  # 1x1 conv after GAP
    # --- decoder ---
    dd = content_dim
    p["dec_res"] = [(conv_init(kg, 3, 3, dd, dd), conv_init(kg, 3, 3, dd, dd))
                    for _ in range(n_res)]
    p["dec_up"] = []
    for _ in range(n_downsample):
        p["dec_up"].append({
            "conv": conv_init(kg, 5, 5, dd, dd // 2),
            "ln_g": jax.random.uniform(kg(), (dd // 2,), jnp.float32),
            "ln_b": jnp.zeros((dd // 2,), jnp.float32),
        })
        dd //= 2
    p["dec_out"] = conv_init(kg, 7, 7, dd, input_dim)
    # --- MLP: style -> AdaIN params (3 linear blocks) ---
    num_adain = n_res * 2 * 2 * content_dim  # (mean, std) per AdaIN layer
    p["mlp"] = [
        linear_init(kg, style_dim, mlp_dim),
        linear_init(kg, mlp_dim, mlp_dim),
        linear_init(kg, mlp_dim, num_adain),
    ]
    return p


# ----------------------------------------------------------------------------
# AdaINGen encode / decode
# ----------------------------------------------------------------------------
def gen_encode(p, x, with_style=False):
    """x: NHWC.  Returns (content NHWC bf16, style (B, style_dim) or None).
    In MUNIT_Trainer.forward the fake style is discarded, so the style-encoder branch
    is skipped (with_style=False) — identical outputs, ~1/3 less encode work."""
    h = conv2d(x, p["ce_conv0"], 7, 7, 1, 3)
    h = instance_norm(h, relu=True)
    for dp in p["ce_down"]:
        h = conv2d(h, dp, 4, 4, 2, 1)
        h = instance_norm(h, relu=True)
    for (c1, c2) in p["ce_res"]:
        r = conv2d(h, c1, 3, 3, 1, 1)
        r = instance_norm(r, relu=True)
        r = conv2d(r, c2, 3, 3, 1, 1)
        h = instance_norm(r, relu=False, skip=h)      # fused residual add
    content = h
    if not with_style:
        return content, None
    # style encoder (norm='none')
    s = conv2d(x, p["se_conv0"], 7, 7, 1, 3, act=1)
    for dp in p["se_down"]:
        s = conv2d(s, dp, 4, 4, 2, 1, act=1)
    s = jnp.mean(s.astype(jnp.float32), axis=(1, 2))  # global average pool (B, C)
    style = matmul_bias_act(s, p["se_out"]["w"], p["se_out"]["b"],
                            act=0, out_dtype=jnp.float32)
    return content, style


def gen_decode(p, content, style):
    """content: NHWC bf16, style: (B, style_dim).  Returns NHWC f32 image in (-1, 1)."""
    bsz = style.shape[0]
    cdim = p["dec_res"][0][0]["b"].shape[0]
    adain = mlp_adain(p["mlp"], style.reshape(bsz, -1))   # fused 3-matmul MLP
    # Layout contract with MUNIT assign_adain_params: (mean, std) per AdaIN layer.
    assert adain.shape[1] == len(p["dec_res"]) * 4 * cdim
    x = content
    idx = 0
    for (c1, c2) in p["dec_res"]:
        mean1 = adain[:, idx : idx + cdim]
        std1 = adain[:, idx + cdim : idx + 2 * cdim]
        idx += 2 * cdim
        mean2 = adain[:, idx : idx + cdim]
        std2 = adain[:, idx + cdim : idx + 2 * cdim]
        idx += 2 * cdim
        r = conv2d(x, c1, 3, 3, 1, 1)
        r = instance_affine_norm(r, std1, mean1, relu=True)
        r = conv2d(r, c2, 3, 3, 1, 1)
        x = instance_affine_norm(r, std2, mean2, relu=False, skip=x)  # fused residual
    for up in p["dec_up"]:
        x = upsample2x(x)
        x = conv2d(x, up["conv"], 5, 5, 1, 2)
        x = layer_norm(x, up["ln_g"], up["ln_b"], relu=True)
    x = conv2d(x, p["dec_out"], 7, 7, 1, 3, act=2, out_dtype=jnp.float32)  # fused tanh
    return x


# ----------------------------------------------------------------------------
# MUNIT_Trainer.forward
# ----------------------------------------------------------------------------
def munit_forward(params_a, params_b, s_a, s_b, x_a, x_b):
    """x_a, x_b: NCHW.  Returns (x_ab, x_ba) in NCHW, same shapes as inputs."""
    xa = jnp.transpose(x_a, (0, 2, 3, 1))
    xb = jnp.transpose(x_b, (0, 2, 3, 1))
    # forward() discards s_a_fake / s_b_fake -> skip the style-encoder branch.
    c_a, _ = gen_encode(params_a, xa, with_style=False)
    c_b, _ = gen_encode(params_b, xb, with_style=False)
    sa = s_a.reshape(s_a.shape[0], -1)
    sb = s_b.reshape(s_b.shape[0], -1)
    x_ba = gen_decode(params_a, c_b, sa)   # gen_a.decode(c_b, s_a)
    x_ab = gen_decode(params_b, c_a, sb)   # gen_b.decode(c_a, s_b)
    return jnp.transpose(x_ab, (0, 3, 1, 2)), jnp.transpose(x_ba, (0, 3, 1, 2))


# ----------------------------------------------------------------------------
# Self-tests exercising the multi-tile (M/N/K and HW) kernel paths
# ----------------------------------------------------------------------------
def _self_test():
    key = jax.random.PRNGKey(42)
    ka, kw, kb, kx, ks, kg = jax.random.split(key, 6)

    # matmul: 2 M tiles (with M pad), 3 N tiles (with N pad), 2 K tiles.
    M, K, N = 260, 1024, 300
    a = jax.random.normal(ka, (M, K), jnp.float32)
    w = jax.random.normal(kw, (K, N), jnp.float32) * 0.05
    bvec = jax.random.normal(kb, (N,), jnp.float32)
    got = matmul_bias_act(a, w, bvec, act=1, out_dtype=jnp.float32)
    ref = jnp.maximum(
        jnp.dot(a.astype(jnp.bfloat16).astype(jnp.float32),
                w.astype(jnp.bfloat16).astype(jnp.float32),
                precision=jax.lax.Precision.HIGHEST) + bvec, 0.0)
    assert bool(jnp.allclose(got, ref, rtol=5e-3, atol=5e-2)), "matmul mismatch"

    # norms: HW=4096 > 2048 -> 2 HW tiles; with fused skip.
    b2, hh, ww, cc = 2, 64, 64, 16
    x = jax.random.normal(kx, (b2, hh, ww, cc), jnp.float32).astype(jnp.bfloat16)
    skip = jax.random.normal(ks, (b2, hh, ww, cc), jnp.float32).astype(jnp.bfloat16)
    gamma = jax.random.normal(kg, (b2, cc), jnp.float32)
    beta = jnp.linspace(-1.0, 1.0, b2 * cc).reshape(b2, cc).astype(jnp.float32)
    xf = x.astype(jnp.float32)

    got_in = instance_affine_norm(x, gamma, beta, relu=False, skip=skip).astype(jnp.float32)
    mu = xf.mean(axis=(1, 2), keepdims=True)
    var = ((xf - mu) ** 2).mean(axis=(1, 2), keepdims=True)
    ref_in = ((xf - mu) * jax.lax.rsqrt(var + 1e-5) * gamma[:, None, None, :]
              + beta[:, None, None, :] + skip.astype(jnp.float32))
    assert bool(jnp.allclose(got_in, ref_in, rtol=5e-2, atol=5e-2)), "instance norm mismatch"

    got_ln = layer_norm(x, gamma[0], beta[0], relu=True).astype(jnp.float32)
    mu = xf.mean(axis=(1, 2, 3), keepdims=True)
    var = xf.var(axis=(1, 2, 3), keepdims=True, ddof=1)
    ref_ln = jnp.maximum((xf - mu) / (jnp.sqrt(var) + 1e-5)
                         * gamma[0][None, None, None, :] + beta[0][None, None, None, :], 0.0)
    assert bool(jnp.allclose(got_ln, ref_ln, rtol=5e-2, atol=5e-2)), "layer norm mismatch"


if __name__ == "__main__":
    _self_test()

    # hyperparameters (small, consistent with the module)
    hp = {
        "input_dim_a": 3, "input_dim_b": 3, "display_size": 2,
        "gen": {"dim": 8, "style_dim": 8, "n_downsample": 2, "n_res": 2, "mlp_dim": 16},
    }
    batch, spatial = 2, 16

    root = jax.random.PRNGKey(0)
    k_pa, k_pb, k_sa, k_sb, k_xa, k_xb = jax.random.split(root, 6)

    g = hp["gen"]
    params_a = init_gen_params(KeyGen(k_pa), hp["input_dim_a"], g["dim"], g["style_dim"],
                               g["n_downsample"], g["n_res"], g["mlp_dim"])
    params_b = init_gen_params(KeyGen(k_pb), hp["input_dim_b"], g["dim"], g["style_dim"],
                               g["n_downsample"], g["n_res"], g["mlp_dim"])

    # fixed style codes (self.s_a / self.s_b = torch.randn(display_size, style_dim, 1, 1))
    s_a = jax.random.normal(k_sa, (hp["display_size"], g["style_dim"], 1, 1), jnp.float32)
    s_b = jax.random.normal(k_sb, (hp["display_size"], g["style_dim"], 1, 1), jnp.float32)

    x_a = jax.random.normal(k_xa, (batch, hp["input_dim_a"], spatial, spatial), jnp.float32)
    x_b = jax.random.normal(k_xb, (batch, hp["input_dim_b"], spatial, spatial), jnp.float32)

    fwd = jax.jit(munit_forward)
    x_ab, x_ba = fwd(params_a, params_b, s_a, s_b, x_a, x_b)
    jax.block_until_ready((x_ab, x_ba))

    assert x_ab.shape == (batch, 3, spatial, spatial)
    assert x_ba.shape == (batch, 3, spatial, spatial)
    assert bool(jnp.all(jnp.isfinite(x_ab))) and bool(jnp.all(jnp.isfinite(x_ba)))
    print("KERNEL_OK")
</pallas_src>

<mosaic_0001>
module attributes {stable_mosaic.version = 11 : i64} {
  func.func @_mm_kernel(%arg0: i32, %arg1: i32, %arg2: i32, %arg3: memref<256x512xbf16, #tpu.memory_space<vmem>>, %arg4: memref<512x128xbf16, #tpu.memory_space<vmem>>, %arg5: memref<1x128xf32, #tpu.memory_space<vmem>>, %arg6: memref<256x128xf32, #tpu.memory_space<vmem>>, %arg7: memref<256x128xf32, #tpu.memory_space<vmem>>) attributes {dimension_semantics = [#tpu.dimension_semantics<parallel>, #tpu.dimension_semantics<parallel>, #tpu.dimension_semantics<arbitrary>], iteration_bounds = array<i64: 2, 3, 2>, scalar_prefetch = 0 : i64, scratch_operands = 1 : i64, tpu.core_type = #tpu.core_type<tc>, window_params = [{transform_indices = @transform_0, window_bounds = array<i64: 256, 512>}, {transform_indices = @transform_1, window_bounds = array<i64: 512, 128>}, {transform_indices = @transform_2, window_bounds = array<i64: 1, 128>}, {transform_indices = @transform_3, window_bounds = array<i64: 256, 128>}]} {
    %c0_i32 = arith.constant 0 : i32
    %0 = arith.cmpi eq, %arg2, %c0_i32 : i32
    %1 = arith.extui %0 : i1 to i32
    %c0_i32_0 = arith.constant 0 : i32
    %2 = arith.cmpi ne, %1, %c0_i32_0 : i32
    scf.if %2 {
      %cst_9 = arith.constant 0.000000e+00 : f32
      %12 = vector.broadcast %cst_9 : f32 to vector<256x128xf32>
      %c0_10 = arith.constant 0 : index
      %c0_11 = arith.constant 0 : index
      %13 = vector.load %arg7[%c0_10, %c0_11] : memref<256x128xf32, #tpu.memory_space<vmem>>, vector<256x128xf32>
      tpu.vector_store %arg7[%c0_10, %c0_11], %12 {strides = array<i32>} : memref<256x128xf32, #tpu.memory_space<vmem>>, vector<256x128xf32>,
    } else {
    }
    %c0 = arith.constant 0 : index
    %c0_1 = arith.constant 0 : index
    %3 = vector.load %arg7[%c0, %c0_1] : memref<256x128xf32, #tpu.memory_space<vmem>>, vector<256x128xf32>
    %c0_2 = arith.constant 0 : index
    %c0_3 = arith.constant 0 : index
    %4 = vector.load %arg3[%c0_2, %c0_3] : memref<256x512xbf16, #tpu.memory_space<vmem>>, vector<256x512xbf16>
    %c0_4 = arith.constant 0 : index
    %c0_5 = arith.constant 0 : index
    %5 = vector.load %arg4[%c0_4, %c0_5] : memref<512x128xbf16, #tpu.memory_space<vmem>>, vector<512x128xbf16>
    %cst = arith.constant dense<0.000000e+00> : vector<256x128xf32>
    %6 = tpu.matmul %4, %5, %cst {dimension_numbers = #tpu.dot_dimension_numbers<[1], [0], [0], [1], [0, 0, 1, 1], [], []>} : vector<256x512xbf16>, vector<512x128xbf16>, vector<256x128xf32> -> vector<256x128xf32>
    %7 = arith.addf %3, %6 : vector<256x128xf32>
    %c0_6 = arith.constant 0 : index
    %c0_7 = arith.constant 0 : index
    %8 = vector.load %arg7[%c0_6, %c0_7] : memref<256x128xf32, #tpu.memory_space<vmem>>, vector<256x128xf32>
    tpu.vector_store %arg7[%c0_6, %c0_7], %7 {strides = array<i32>} : memref<256x128xf32, #tpu.memory_space<vmem>>, vector<256x128xf32>,
    %c1_i32 = arith.constant 1 : i32
    %9 = arith.cmpi eq, %arg2, %c1_i32 : i32
    %10 = arith.extui %9 : i1 to i32
    %c0_i32_8 = arith.constant 0 : i32
    %11 = arith.cmpi ne, %10, %c0_i32_8 : i32
    scf.if %11 {
      %c0_9 = arith.constant 0 : index
      %c0_10 = arith.constant 0 : index
      %12 = vector.load %arg7[%c0_9, %c0_10] : memref<256x128xf32, #tpu.memory_space<vmem>>, vector<256x128xf32>
      %c0_11 = arith.constant 0 : index
      %c0_12 = arith.constant 0 : index
      %13 = vector.load %arg5[%c0_11, %c0_12] : memref<1x128xf32, #tpu.memory_space<vmem>>, vector<1x128xf32>
      %14 = vector.broadcast %13 : vector<1x128xf32> to vector<256x128xf32>
      %15 = arith.addf %12, %14 : vector<256x128xf32>
      %cst_13 = arith.constant 0.000000e+00 : f32
      %16 = vector.broadcast %cst_13 : f32 to vector<256x128xf32>
      %17 = arith.maximumf %15, %16 : vector<256x128xf32>
      %c0_14 = arith.constant 0 : index
      %c0_15 = arith.constant 0 : index
      %18 = vector.load %arg6[%c0_14, %c0_15] : memref<256x128xf32, #tpu.memory_space<vmem>>, vector<256x128xf32>
      tpu.vector_store %arg6[%c0_14, %c0_15], %17 {strides = array<i32>} : memref<256x128xf32, #tpu.memory_space<vmem>>, vector<256x128xf32>,
    } else {
    }
    return
  }
  func.func @transform_0(%arg0: i32, %arg1: i32, %arg2: i32) -> (i32, i32) {
    %c0_i32 = arith.constant 0 : i32
    return %arg0, %arg2 : i32, i32
  }
  func.func @transform_1(%arg0: i32, %arg1: i32, %arg2: i32) -> (i32, i32) {
    %c0_i32 = arith.constant 0 : i32
    return %arg2, %arg1 : i32, i32
  }
  func.func @transform_2(%arg0: i32, %arg1: i32, %arg2: i32) -> (i32, i32) {
    %c0_i32 = arith.constant 0 : i32
    %c0_i32_0 = arith.constant 0 : i32
    return %c0_i32, %arg1 : i32, i32
  }
  func.func @transform_3(%arg0: i32, %arg1: i32, %arg2: i32) -> (i32, i32) {
    %c0_i32 = arith.constant 0 : i32
    return %arg0, %arg1 : i32, i32
  }
}

</mosaic_0001>

<bundles_post_ra>
// kernel: tpu_custom_call.1
= control target key start
LH: loop header
LB: loop body
LE: loop exit
PB: predicated region body
PF: predicated region fallthrough
CT: control target
= control target key end

     0   :  { %s3123_s0 = inlined_call_operand.hbm [shape: bf16[512,1024], index: 0, kind: input, shape index: {}]   ;;  %s3124_s1 = inlined_call_operand.hbm [shape: bf16[1024,384], index: 1, kind: input, shape index: {}]   ;;  %s3125_s2 = inlined_call_operand.vmem [shape: f32[1,384], index: 2, kind: input, shape index: {}]   ;;  %s3126_s3 = inlined_call_operand.hbm [shape: f32[512,384], index: 3, kind: output, shape index: {}]  }
   0x1   :  { %3141 = sst [smem:[#allocation21_spill]] %s3123_s0 }
   0x2   :  { %3142 = sst [smem:[#allocation22_spill]] %s3125_s2 }
   0x3   :  { %3143 = sst [smem:[#allocation23_spill]] %s3126_s3 }
   0x4   :  { %8 = vsyncpa [#allocation4], 0 }
   0x5   :  { %10 = vsyncpa [#allocation4 + $0x1], 0 }
   0x6   :  { %11 = vsyncpa [#allocation7], 0 }
   0x7   :  { %13 = vsyncpa [#allocation7 + $0x1], 0 }
   0x8   :  { %14 = vsyncpa [#allocation5], 0 }
   0x9   :  { %16 = vsyncpa [#allocation5 + $0x1], 0  ;;  %s2551_s12 = smov 0   ;;  %s2553_s13 = smov 0  }
   0xa   :  { %s2555_s14 = smov 0   ;;  %s2557_s15 = smov 0  }
   0xb   :  { %s2559_s16 = smov 0   ;;  %s2561_s17 = smov 0  }
   0xc   :  { %s2563_s18 = smov 0   ;;  %s2565_s19 = smov 0  }
   0xd   :  { %s2567_s20 = smov 0   ;;  %s2569_s21 = smov 0  }
   0xe   :  { %s2571_s22 = smov 0   ;;  %s2573_s23 = smov 0  }
   0xf   :  { %s2575_s24 = smov 0   ;;  %s2577_s25 = smov 0  }
  0x10   :  { %s2579_s26 = smov 0   ;;  %s2581_s27 = smov 0  }
  0x11 LB: > { %3144 = sst [smem:[#allocation12_spill]] %s2492_s21  ;;  %s1656_s28 = sadd.s32 4294967295, %s2516_s27   ;;  %s2516_s27 = sphi %s2581_s27, %s22_s27   ;;  %s2512_s26 = sphi %s2579_s26, %s3193_s26   ;;  %s2508_s25 = sphi %s2577_s25, %s3206_s25   ;;  %s2504_s24 = sphi %s2575_s24, %s3205_s24   ;;  %s2500_s23 = sphi %s2573_s23, %s3190_s23   ;;  %s2496_s22 = sphi %s2571_s22, %s3204_s22   ;;  %s2492_s21 = sphi %s2569_s21, %s3203_s21   ;;  %s2488_s20 = sphi %s2567_s20, %s3202_s20   ;;  %s2484_s19 = sphi %s2565_s19, %s3201_s19   ;;  %s2480_s18 = sphi %s2563_s18, %s3200_s18   ;;  %s2476_s17 = sphi %s2561_s17, %s3199_s17   ;;  %s2472_s16 = sphi %s2559_s16, %s3198_s16   ;;  %s2468_s15 = sphi %s2557_s15, %s3197_s15   ;;  %s2464_s14 = sphi %s2555_s14, %s3196_s14   ;;  %s2460_s13 = sphi %s2553_s13, %s3195_s13   ;;  %s2456_s12 = sphi %s2551_s12, %s3194_s12  }
  0x12   : > { %3145 = sst [smem:[#allocation13_spill]] %s2496_s22  ;;  %s34_s29 = sadd.s32 1, %s2504_s24 }
  0x13   : > { %3146 = sst [smem:[#allocation14_spill]] %s2500_s23  ;;  %p2631_p0 = scmp.ge.s32.totalorder %s34_s29, 2 }
  0x14   : > { %3147 = sst [smem:[#allocation15_spill]] %s2512_s26  ;;  %p57_p1 = scmp.ne.s32.totalorder %s2488_s20, %s2484_s19 }
  0x15   : > { %s3208_s29 = smov (%p2631_p0, %s34_s29), 0  ;;  %p3133_p2 = scmp.eq.s32.totalorder %s2516_s27, 0 }
  0x16   : > { %3149 = sst [smem:[#allocation16_spill]] %s3208_s29  ;;  %p63_p3 = scmp.ne.s32.totalorder %s2484_s19, %s2480_s18 }
  0x17   : > { %s2647_s6 = ssub.s32 %s2504_s24, %s3208_s29  ;;  %p2649_p4 = scmp.eq.s32.totalorder %s1656_s28, 0 }
  0x18   : > { %p2655_p5 = por %p3133_p2, %p57_p1  ;;  %p2659_p6 = scmp.eq.s32.totalorder %s1656_s28, 11 }
  0x19   : > { %s3150_s7 = scalar_select %p2649_p4, 1, 0 }
  0x1a   : > { %s3152_s9 = scalar_select %p2659_p6, 1, 0 }
  0x1b   : > { %p2665_p7 = por %p2649_p4, %p63_p3  ;;  %p3132_p8 = scmp.lt.s32.totalorder %s2516_s27, 12 }
  0x1c   : > { %s169_s11 = sand.u32 1, %s2488_s20   ;;  %s1662_s5 = sshll.u32 %s2504_s24, 2 }
  0x1d   : > { %s3153_s10 = scalar_select %p2665_p7, 1, 0 }
  0x1e   : > { %s1660_s18 = sshll.u32 %s169_s11, 9  ;;  %s1778_s4 = sshll.u32 %s2512_s26, 8 }
  0x1f   : > { %3154 = sst [smem:[#allocation17_spill]] %s3153_s10  ;;  %s173_s29 = scalar_lea.vmem [#allocation3], %s1660_s18 }
  0x20   : > { %s183_s3 = sshll.u32 %s173_s29, 4  ;;  %s180_s23 = sadd.s32 %s1778_s4, %s1662_s5  ;;  %s2673_s3 = int_to_ptr.vmem [resolvable:$true] %s183_s3 }
  0x21   : > { %s1664_s21 = sshll.u32 %s180_s23, 6  ;;  %p2679_p9 = pnand %p3132_p8, %p2655_p5 }
  0x22   : > { %s3156_s0 = sld [smem:[#allocation21_spill]]  ;;  %s2689_s29 = scalar_lea.sflag [#allocation4], %s169_s11 }
  0x23   : > { %p2292_p12 = pneg %p2679_p9 }
  0x28   : > { %s2686_s10 = scalar_lea.hbm %s3156_s0, %s1664_s21  ;;  %s2295_s21 = scalar_lea.hbm %s3156_s0, 32768 }
  0x29   : > { %s2290_s23 = scalar_lea.hbm %s2686_s10, 8192  ;;  %p2296_p3 = scmp.lt.u32.totalorder %s2686_s10, %s3156_s0 }
  0x2a   : > { %p2291_p11 = scmp.ne.s32.totalorder %s2686_s10, %s2290_s23  ;;  %p2297_p5 = scmp.lt.u32.totalorder %s2295_s21, %s2290_s23 }
  0x2b   : > { %p2299_p2 = scmp.lt.u32.totalorder %s2290_s23, %s2686_s10 }
  0x2c   : > { %p2293_p13 = pnand %p2292_p12, %p2291_p11  ;;  %p2298_p8 = por %p2297_p5, %p2296_p3 }
  0x2e   : > { %p2294_p1 = pneg %p2293_p13  ;;  %p2300_p10 = por %p2299_p2, %p2298_p8 }
  0x30   : > { %p2301_p7 = pnand %p2300_p10, %p2294_p1 }
  0x32   : > { %2304 = shalt.err (!%p2301_p7)
}
  0x33   : > { %s2305_s8 = scalar_lea.vmem %s2673_s3, 8192  ;;  %s2518_s11 = smov [#allocation3]  }
  0x34   : > { %p2306_p11 = scmp.ne.s32.totalorder %s2673_s3, %s2305_s8  ;;  %s2310_s18 = sshll.u32 %s2518_s11, 4  ;;  %s2311_s18 = int_to_ptr.vmem [resolvable:$false] %s2310_s18 }
  0x35   : > { %s2312_s2 = scalar_lea.vmem %s2311_s18, 16384  ;;  %p2313_p4 = scmp.lt.s32.totalorder %s2673_s3, %s2311_s18 }
  0x36   : > { %p2308_p13 = pnand %p2306_p11, %p2292_p12  ;;  %p2314_p3 = scmp.lt.s32.totalorder %s2312_s2, %s2305_s8 }
  0x38   : > { %p2309_p6 = pneg %p2308_p13  ;;  %p2315_p5 = por %p2314_p3, %p2313_p4 }
  0x3a   : > { %p2316_p2 = pnand %p2315_p5, %p2309_p6 }
  0x3c   : > { %2319 = shalt.err (!%p2316_p2)
}
  0x3d   : > { %s2519_s23 = smov 512   ;;  %s2520_s22 = smov 256  }
  0x3e   : > { %s2521_s21 = smov 16   ;;  %p220_p4 = scmp.lt.s32.totalorder %s2516_s27, 13 }
  0x3f   : > { %2014 = dma.hbm_to_vmem [thread:$0]  (!%p2679_p9), %s2686_s10, 8192, %s2673_s3, %s2689_s29, %s2519_s23, %s2520_s22, %s2521_s21  }
  0x40   : > { %p3157_p6 = scmp.ge.s32.totalorder %s2516_s27, 1  ;;  %s1657_s5 = sadd.s32 4294967294, %s2516_s27  }
  0x41   : > { %s37_s8 = sadd.s32 1, %s2508_s25  ;;  %s78_s11 = sadd.s32 1, %s2476_s17 }
  0x42   : > { %p2720_p7 = pnand %p3157_p6, %p220_p4  ;;  %s3210_s8 = smov (!%p2631_p0, %s37_s8), %s2508_s25 }
  0x43   : > { %p85_p8 = scmp.ne.s32.totalorder %s2476_s17, %s2472_s16  ;;  %p39_p10 = scmp.ge.s32.totalorder %s3210_s8, 3 }
  0x44   : > { %p91_p9 = scmp.ne.s32.totalorder %s2472_s16, %s2468_s15  ;;  %p3159_p12 = scmp.eq.s32.totalorder %s2516_s27, 0 }
  0x45   : > { %s132_s10 = sadd.s32 1, %s2464_s14  ;;  %s3212_s8 = smov (%p39_p10, %s3210_s8), 0 }
  0x46   : > { %p2736_p1 = por %p85_p8, %p3159_p12  ;;  %3161 = sst [smem:[#allocation18_spill]] %s3212_s8 }
  0x47   : > { %s3162_s28 = sadd.s32 1, %s2512_s26  ;;  %s74_s30 = ssub.s32 %s2508_s25, %s3212_s8 }
  0x48   : > { %s3214_s28 = smov (!%p39_p10, %s3162_s28), %s2512_s26  ;;  %p3163_p0 = scmp.ne.s32.totalorder %s3150_s7, 0 }
  0x49   : > { %p43_p13 = scmp.ge.s32.totalorder %s3214_s28, 2  ;;  %s75_s15 = sor.u32 %s74_s30, %s2647_s6 }
  0x4a   : > { %p2750_p11 = por %p91_p9, %p3163_p0  ;;  %p76_p3 = scmp.eq.s32.totalorder %s75_s15, 0 }
  0x4b   : > { %p142_p5 = scmp.ne.s32.totalorder %s2464_s14, %s2460_s13  ;;  %s3216_s28 = smov (%p43_p13, %s3214_s28), 0 }
  0x4c   : > { %s3164_s29 = scalar_select %p2750_p11, 1, 0 }
  0x4d   : > { %3165 = sst [smem:[#allocation19_spill]] %s3216_s28  ;;  %s45_s2 = ssub.s32 %s2512_s26, %s3216_s28 }
  0x4e   : > { %s2760_s18 = scalar_select %p76_p3, %s2476_s17, %s78_s11  }
  0x4f   : > { %p3167_p2 = scmp.ne.s32.totalorder %s3152_s9, 0  ;;  %s47_s23 = sor.u32 %s2647_s6, %s45_s2 }
  0x50   : > { %3166 = sst [smem:[#allocation20_spill]] %s2760_s18  ;;  %s129_s22 = sor.u32 %s74_s30, %s45_s2 }
  0x51   : > { %p2766_p4 = por %p3167_p2, %p142_p5  ;;  %p48_p6 = scmp.eq.s32.totalorder %s47_s23, 0 }
  0x52   : > { %p130_p8 = scmp.eq.s32.totalorder %s129_s22, 0  ;;  %p148_p10 = scmp.ne.s32.totalorder %s2460_s13, %s2456_s12 }
  0x53   : > { %s3168_s7 = scalar_select %p2766_p4, 1, 0 }
  0x54   : > { %p149_p9 = scmp.eq.s32.totalorder %s1657_s5, 11  ;;  %s3169_s21 = sadd.s32 1, %s2488_s20 }
  0x55   : > { %s2776_s15 = scalar_select %p48_p6, %s2488_s20, %s3169_s21  }
  0x56   : > { %s2779_s11 = scalar_select %p130_p8, %s2464_s14, %s132_s10  }
  0x57   : > { %p2781_p12 = por %p149_p9, %p148_p10  ;;  %s193_s0 = sand.u32 1, %s2476_s17  }
  0x58   : > { %s1665_s28 = sshll.u32 %s193_s0, 8  ;;  %s2003_s8 = smul.u32 192, %s2504_s24 }
  0x59   : > { %s3170_s9 = scalar_select %p2781_p12, 1, 0 }
  0x5a   : > { %s197_s26 = scalar_lea.vmem [#allocation6], %s1665_s28  ;;  %p3171_p0 = scmp.lt.s32.totalorder %s2516_s27, 12 }
  0x5b   : > { %s206_s18 = sshll.u32 %s197_s26, 4  ;;  %s203_s5 = sadd.s32 %s2508_s25, %s2003_s8  ;;  %s2796_s18 = int_to_ptr.vmem [resolvable:$true] %s206_s18 }
  0x5c   : > { %p2791_p13 = pnand %p3171_p0, %p2736_p1  ;;  %s1668_s10 = sshll.u32 %s203_s5, 6 }
  0x5d   : > { %s2801_s23 = scalar_lea.hbm %s3124_s1, %s1668_s10  ;;  %s2803_s26 = scalar_lea.sflag [#allocation7], %s193_s0 }
  0x5e   : > { %s2320_s3 = scalar_lea.hbm %s2801_s23, 4096  ;;  %p2322_p3 = pneg %p2791_p13 }
  0x5f   : > { %p2321_p1 = scmp.ne.s32.totalorder %s2801_s23, %s2320_s3  ;;  %s2325_s22 = scalar_lea.hbm %s3124_s1, 24576 }
  0x60   : > { %p2326_p6 = scmp.lt.u32.totalorder %s2801_s23, %s3124_s1  ;;  %p2327_p8 = scmp.lt.u32.totalorder %s2325_s22, %s2320_s3 }
  0x61   : > { %p2323_p5 = pnand %p2322_p3, %p2321_p1  ;;  %p2329_p9 = scmp.lt.u32.totalorder %s2320_s3, %s2801_s23 }
  0x62   : > { %p2328_p10 = por %p2327_p8, %p2326_p6 }
  0x63   : > { %p2324_p2 = pneg %p2323_p5 }
  0x64   : > { %p2330_p0 = por %p2329_p9, %p2328_p10 }
  0x66   : > { %p2331_p12 = pnand %p2330_p0, %p2324_p2 }
  0x68   : > { %2334 = shalt.err (!%p2331_p12)
}
  0x69   : > { %s2335_s0 = scalar_lea.vmem %s2796_s18, 4096  ;;  %s2522_s10 = smov [#allocation6]  }
  0x6a   : > { %p2336_p1 = scmp.ne.s32.totalorder %s2796_s18, %s2335_s0  ;;  %s2340_s30 = sshll.u32 %s2522_s10, 4  ;;  %s2341_s30 = int_to_ptr.vmem [resolvable:$false] %s2340_s30 }
  0x6b   : > { %s2342_s2 = scalar_lea.vmem %s2341_s30, 8192  ;;  %p2343_p11 = scmp.lt.s32.totalorder %s2796_s18, %s2341_s30 }
  0x6c   : > { %p2338_p5 = pnand %p2336_p1, %p2322_p3  ;;  %p2344_p6 = scmp.lt.s32.totalorder %s2342_s2, %s2335_s0 }
  0x6e   : > { %p2339_p4 = pneg %p2338_p5  ;;  %p2345_p8 = por %p2344_p6, %p2343_p11 }
  0x70   : > { %p2346_p10 = pnand %p2345_p8, %p2339_p4 }
  0x72   : > { %2349 = shalt.err (!%p2346_p10)
}
  0x73   : > { %s2523_s3 = smov 192   ;;  %s2524_s8 = smov 64  }
  0x74   : > { %s2525_s28 = smov 4   ;;  %224 = sbr.rel (%p2720_p7) target bundleno = 576 (0x240), region = 32 }
  0x75   : > { %2017 = dma.hbm_to_vmem [thread:$0]  (!%p2791_p13), %s2801_s23, 4096, %s2796_s18, %s2803_s26, %s2523_s3, %s2524_s8, %s2525_s28  }
  0x76   : > { %s3173_s22 = sld [smem:[#allocation17_spill]] (!%p2720_p7)  ;;  %s226_s21 = sand.u32 (!%p2720_p7), 1, %s2484_s19  }
  0x77   : > { %s1670_s5 = sshll.u32 (!%p2720_p7), %s226_s21, 9  ;;  %s227_s0 = scalar_lea.sflag (!%p2720_p7), [#allocation4], %s226_s21 }
  0x78   : > { %s2834_s10 = scalar_lea.vmem (!%p2720_p7), [#allocation3], %s1670_s5 }
  0x7c   : > { %p3174_p11 = scmp.ne.s32.totalorder %s3173_s22, 0 }
  0x7e   : > { %2443 = dma.done.wait (%p3174_p11), %s227_s0, 8192  }
  0x7f   : > { %2445 = vsyncadd (%p3174_p11), %s227_s0, 4294959104  ;;  %s235_s30 = sand.u32 1, %s2472_s16   ;;  %p3175_p7 = scmp.ne.s32.totalorder %s3164_s29, 0 }
  0x80   : > { %s1671_s6 = sshll.u32 %s235_s30, 8  ;;  %s236_s18 = scalar_lea.sflag [#allocation7], %s235_s30 }
  0x81   : > { %s2841_s23 = scalar_lea.vmem [#allocation6], %s1671_s6 }
  0x82   : > { %2447 = dma.done.wait (%p3175_p7), %s236_s18, 4096  }
  0x83   : > { %2449 = vsyncadd (%p3175_p7), %s236_s18, 4294963200  ;;  %s3176_s4 = sld [smem:[#allocation13_spill]]  ;;  %s267_s26 = sand.u32 1, %s2460_s13  }
  0x84   : > { %s1672_s2 = sshll.u32 %s267_s26, 8  ;;  %s3177_s28 = sld [smem:[#allocation22_spill]] }
  0x85   : > { %s2858_s21 = scalar_lea.vmem [#allocation8], %s1672_s2  ;;  %s3178_s5 = sld [smem:[#allocation12_spill]] }
  0x89   : > { %p273_p4 = scmp.lt.s32.totalorder %s3176_s4, 2 }
  0x8b   : > { %s3218_s4 = smov (!%p273_p4, %s3176_s4), 2  ;;  %p1673_p12 = scmp.ne.s32.totalorder %s3178_s5, 0 }
  0x8c   : > { %s275_s22 = scalar_lea.vmem %s3177_s28, %s3218_s4  ;;  %v2526_v0 = vmov (!%p1673_p12), 0.0  }
  0x8d   : > { %281 = sbr.rel (%p1673_p12) target bundleno = 157 (0x9d), region = 44  ;;  %282 = vst [vmem:[#allocation2] sm:$0xff] (!%p1673_p12), %v2526_v0  ;;  %283 = vst [vmem:[#allocation2 + $0x8] sm:$0xff] (!%p1673_p12), %v2526_v0 }
  0x8e   : > { %284 = vst [vmem:[#allocation2 + $0x10] sm:$0xff] (!%p1673_p12), %v2526_v0  ;;  %285 = vst [vmem:[#allocation2 + $0x18] sm:$0xff] (!%p1673_p12), %v2526_v0 }
  0x8f   : > { %286 = vst [vmem:[#allocation2 + $0x20] sm:$0xff] (!%p1673_p12), %v2526_v0  ;;  %287 = vst [vmem:[#allocation2 + $0x28] sm:$0xff] (!%p1673_p12), %v2526_v0 }
  0x90   : > { %288 = vst [vmem:[#allocation2 + $0x30] sm:$0xff] (!%p1673_p12), %v2526_v0  ;;  %289 = vst [vmem:[#allocation2 + $0x38] sm:$0xff] (!%p1673_p12), %v2526_v0 }
  0x91   : > { %290 = vst [vmem:[#allocation2 + $0x40] sm:$0xff] (!%p1673_p12), %v2526_v0  ;;  %291 = vst [vmem:[#allocation2 + $0x48] sm:$0xff] (!%p1673_p12), %v2526_v0 }
  0x92   : > { %292 = vst [vmem:[#allocation2 + $0x50] sm:$0xff] (!%p1673_p12), %v2526_v0  ;;  %293 = vst [vmem:[#allocation2 + $0x58] sm:$0xff] (!%p1673_p12), %v2526_v0 }
  0x93   : > { %294 = vst [vmem:[#allocation2 + $0x60] sm:$0xff] (!%p1673_p12), %v2526_v0  ;;  %295 = vst [vmem:[#allocation2 + $0x68] sm:$0xff] (!%p1673_p12), %v2526_v0 }
  0x94   : > { %296 = vst [vmem:[#allocation2 + $0x70] sm:$0xff] %v2526_v0  ;;  %297 = vst [vmem:[#allocation2 + $0x78] sm:$0xff] %v2526_v0 }
  0x95   : > { %298 = vst [vmem:[#allocation2 + $0x80] sm:$0xff] %v2526_v0  ;;  %299 = vst [vmem:[#allocation2 + $0x88] sm:$0xff] %v2526_v0 }
  0x96   : > { %300 = vst [vmem:[#allocation2 + $0x90] sm:$0xff] %v2526_v0  ;;  %301 = vst [vmem:[#allocation2 + $0x98] sm:$0xff] %v2526_v0 }
  0x97   : > { %302 = vst [vmem:[#allocation2 + $0xa0] sm:$0xff] %v2526_v0  ;;  %303 = vst [vmem:[#allocation2 + $0xa8] sm:$0xff] %v2526_v0 }
  0x98   : > { %304 = vst [vmem:[#allocation2 + $0xb0] sm:$0xff] %v2526_v0  ;;  %305 = vst [vmem:[#allocation2 + $0xb8] sm:$0xff] %v2526_v0 }
  0x99   : > { %306 = vst [vmem:[#allocation2 + $0xc0] sm:$0xff] %v2526_v0  ;;  %307 = vst [vmem:[#allocation2 + $0xc8] sm:$0xff] %v2526_v0 }
  0x9a   : > { %308 = vst [vmem:[#allocation2 + $0xd0] sm:$0xff] %v2526_v0  ;;  %309 = vst [vmem:[#allocation2 + $0xd8] sm:$0xff] %v2526_v0 }
  0x9b   : > { %310 = vst [vmem:[#allocation2 + $0xe0] sm:$0xff] %v2526_v0  ;;  %311 = vst [vmem:[#allocation2 + $0xe8] sm:$0xff] %v2526_v0 }
  0x9c   : > { %312 = vst [vmem:[#allocation2 + $0xf0] sm:$0xff] %v2526_v0  ;;  %313 = vst [vmem:[#allocation2 + $0xf8] sm:$0xff] %v2526_v0 }
  0x9d PF: > { %v2162_v1 = vld [vmem:[%s2841_s23 + $0x40] sm:$0xff]   ;;  %v2166_v5 = vld [vmem:[%s2841_s23 + $0x48] sm:$0xff]   ;;  %v2170_v9 = vld [vmem:[%s2841_s23 + $0x50] sm:$0xff]   ;;  %s3179_s29 = sld [smem:[#allocation12_spill]] }
  0x9e   : > { %v2163_v2 = vld [vmem:[%s2841_s23 + $0xc0] sm:$0xff]   ;;  %1779 = vmatprep.subr.bf16.mxu0 %v2162_v1  ;;  %v2167_v6 = vld [vmem:[%s2841_s23 + $0xc8] sm:$0xff]   ;;  %v2171_v10 = vld [vmem:[%s2841_s23 + $0xd0] sm:$0xff]  }
  0x9f   : > { %v2164_v3 = vld [vmem:[%s2841_s23] sm:$0xff]   ;;  %1891 = vmatprep.subr.bf16.mxu1 %v2163_v2  ;;  %v2168_v7 = vld [vmem:[%s2841_s23 + $0x8] sm:$0xff]   ;;  %v2172_v11 = vld [vmem:[%s2841_s23 + $0x10] sm:$0xff]  }
  0xa0   : > { %v2165_v4 = vld [vmem:[%s2841_s23 + $0x80] sm:$0xff]   ;;  %1780 = vmatpush3.bf16.msra.mxu0 %v2164_v3  ;;  %v2169_v8 = vld [vmem:[%s2841_s23 + $0x88] sm:$0xff]   ;;  %v2173_v12 = vld [vmem:[%s2841_s23 + $0x90] sm:$0xff]  }
  0xa1   : > { %1892 = vmatpush3.bf16.msra.mxu1 %v2165_v4  ;;  %1781 = vmatprep.subr.bf16.mxu0 %v2166_v5  ;;  %v2174_v13 = vld [vmem:[%s2841_s23 + $0x58] sm:$0xff]   ;;  %v2178_v17 = vld [vmem:[%s2841_s23 + $0x60] sm:$0xff]   ;;  %v2182_v21 = vld [vmem:[%s2841_s23 + $0x68] sm:$0xff]  }
  0xa2   : > { %1893 = vmatprep.subr.bf16.mxu1 %v2167_v6  ;;  %v2175_v14 = vld [vmem:[%s2841_s23 + $0xd8] sm:$0xff]   ;;  %v2179_v18 = vld [vmem:[%s2841_s23 + $0xe0] sm:$0xff]   ;;  %v2183_v22 = vld [vmem:[%s2841_s23 + $0xe8] sm:$0xff]  }
  0xa3   : > { %v2176_v15 = vld [vmem:[%s2841_s23 + $0x18] sm:$0xff]   ;;  %v2180_v19 = vld [vmem:[%s2841_s23 + $0x20] sm:$0xff]   ;;  %v2184_v23 = vld [vmem:[%s2841_s23 + $0x28] sm:$0xff]   ;;  %p1770_p13 = scmp.ne.s32.totalorder %s3179_s29, 1 }
  0xa4   : > { %1782 = vmatpush3.bf16.msra.mxu0 %v2168_v7  ;;  %v2177_v16 = vld [vmem:[%s2841_s23 + $0x98] sm:$0xff]   ;;  %v2181_v20 = vld [vmem:[%s2841_s23 + $0xa0] sm:$0xff]   ;;  %v2185_v24 = vld [vmem:[%s2841_s23 + $0xa8] sm:$0xff]  }
  0xa5   : > { %1894 = vmatpush3.bf16.msra.mxu1 %v2169_v8  ;;  %1783 = vmatprep.subr.bf16.mxu0 %v2170_v9  ;;  %v2186_v25 = vld [vmem:[%s2841_s23 + $0x70] sm:$0xff]   ;;  %v2190_v29 = vld [vmem:[%s2841_s23 + $0x78] sm:$0xff]  }
  0xa6   : > { %1895 = vmatprep.subr.bf16.mxu1 %v2171_v10  ;;  %v2187_v26 = vld [vmem:[%s2841_s23 + $0xf0] sm:$0xff]   ;;  %v2191_v30 = vld [vmem:[%s2841_s23 + $0xf8] sm:$0xff]  }
  0xa7   : > { %v2188_v27 = vld [vmem:[%s2841_s23 + $0x30] sm:$0xff]   ;;  %v2192_v31 = vld [vmem:[%s2841_s23 + $0x38] sm:$0xff]  }
  0xa8   : > { %1784 = vmatpush3.bf16.msra.mxu0 %v2172_v11  ;;  %v2189_v28 = vld [vmem:[%s2841_s23 + $0xb0] sm:$0xff]   ;;  %v2193_v32 = vld [vmem:[%s2841_s23 + $0xb8] sm:$0xff]  }
  0xa9   : > { %1896 = vmatpush3.bf16.msra.mxu1 %v2173_v12  ;;  %1785 = vmatprep.subr.bf16.mxu0 %v2174_v13  ;;  %v2194_v33 = vld [vmem:[%s2834_s10] ss:$16 sps:$4 sm:$0xff]   ;;  %v2196_v34 = vld [vmem:[%s2834_s10 + $0x4] ss:$16 sps:$4 sm:$0xff]   ;;  %v2197_v35 = vld [vmem:[%s2834_s10 + $0x8] ss:$16 sps:$4 sm:$0xff]  }
  0xaa   : > { %1897 = vmatprep.subr.bf16.mxu1 %v2175_v14  ;;  %v2199_v36 = vld [vmem:[%s2834_s10 + $0xc] ss:$16 sps:$4 sm:$0xff]   ;;  %1018 = vmatprep.mubr.bf16.mxu0 %v2196_v34  ;;  %v2200_v37 = vld [vmem:[%s2834_s10 + $0x24] ss:$16 sps:$4 sm:$0xff]   ;;  %v2204_v39 = vld [vmem:[%s2834_s10 + $0x20] ss:$16 sps:$4 sm:$0xff]  }
  0xab   : > { %1179 = vmatprep.mubr.bf16.mxu1 %v2199_v36  ;;  %v2202_v38 = vld [vmem:[%s2834_s10 + $0x2c] ss:$16 sps:$4 sm:$0xff]   ;;  %v2205_v40 = vld [vmem:[%s2834_s10 + $0x28] ss:$16 sps:$4 sm:$0xff]   ;;  %v2206_v41 = vld [vmem:[%s2834_s10 + $0x44] ss:$16 sps:$4 sm:$0xff]  }
  0xac   : > { %1786 = vmatpush3.bf16.msra.mxu0 %v2176_v15  ;;  %v2208_v42 = vld [vmem:[%s2834_s10 + $0x4c] ss:$16 sps:$4 sm:$0xff]   ;;  %v2210_v43 = vld [vmem:[%s2834_s10 + $0x40] ss:$16 sps:$4 sm:$0xff]   ;;  %v2211_v44 = vld [vmem:[%s2834_s10 + $0x48] ss:$16 sps:$4 sm:$0xff]  }
  0xad   : > { %1898 = vmatpush3.bf16.msra.mxu1 %v2177_v16  ;;  %1787 = vmatprep.subr.bf16.mxu0 %v2178_v17  ;;  %v2212_v45 = vld [vmem:[%s2834_s10 + $0x64] ss:$16 sps:$4 sm:$0xff]   ;;  %v2214_v46 = vld [vmem:[%s2834_s10 + $0x6c] ss:$16 sps:$4 sm:$0xff]   ;;  %v2216_v47 = vld [vmem:[%s2834_s10 + $0x60] ss:$16 sps:$4 sm:$0xff]  }
  0xae   : > { %1899 = vmatprep.subr.bf16.mxu1 %v2179_v18  ;;  %v2217_v48 = vld [vmem:[%s2834_s10 + $0x68] ss:$16 sps:$4 sm:$0xff]   ;;  %v2218_v49 = vld [vmem:[%s2834_s10 + $0x84] ss:$16 sps:$4 sm:$0xff]   ;;  %v2220_v50 = vld [vmem:[%s2834_s10 + $0x8c] ss:$16 sps:$4 sm:$0xff]  }
  0xaf   : > { %v2222_v51 = vld [vmem:[%s2834_s10 + $0x80] ss:$16 sps:$4 sm:$0xff]   ;;  %v2223_v52 = vld [vmem:[%s2834_s10 + $0x88] ss:$16 sps:$4 sm:$0xff]   ;;  %v2224_v53 = vld [vmem:[%s2834_s10 + $0xa4] ss:$16 sps:$4 sm:$0xff]  }
  0xb0   : > { %1788 = vmatpush3.bf16.msra.mxu0 %v2180_v19  ;;  %v2226_v54 = vld [vmem:[%s2834_s10 + $0xac] ss:$16 sps:$4 sm:$0xff]   ;;  %v2228_v55 = vld [vmem:[%s2834_s10 + $0xa0] ss:$16 sps:$4 sm:$0xff]   ;;  %v2229_v56 = vld [vmem:[%s2834_s10 + $0xa8] ss:$16 sps:$4 sm:$0xff]  }
  0xb1   : > { %1900 = vmatpush3.bf16.msra.mxu1 %v2181_v20  ;;  %1789 = vmatprep.subr.bf16.mxu0 %v2182_v21  ;;  %v2230_v57 = vld [vmem:[%s2834_s10 + $0xc4] ss:$16 sps:$4 sm:$0xff]   ;;  %v2232_v58 = vld [vmem:[%s2834_s10 + $0xcc] ss:$16 sps:$4 sm:$0xff]   ;;  %v2234_v59 = vld [vmem:[%s2834_s10 + $0xc0] ss:$16 sps:$4 sm:$0xff]  }
  0xb2   : > { %1901 = vmatprep.subr.bf16.mxu1 %v2183_v22  ;;  %v2235_v60 = vld [vmem:[%s2834_s10 + $0xc8] ss:$16 sps:$4 sm:$0xff]   ;;  %v2236_v61 = vld [vmem:[%s2834_s10 + $0xe4] ss:$16 sps:$4 sm:$0xff]   ;;  %v2238_v62 = vld [vmem:[%s2834_s10 + $0xec] ss:$16 sps:$4 sm:$0xff]  }
  0xb3   : > { %v2240_v63 = vld [vmem:[%s2834_s10 + $0xe0] ss:$16 sps:$4 sm:$0xff]   ;;  %v2241_v0 = vld [vmem:[%s2834_s10 + $0xe8] ss:$16 sps:$4 sm:$0xff]   ;;  %v2242_v1 = vld [vmem:[%s2834_s10 + $0x104] ss:$16 sps:$4 sm:$0xff]  }
  0xb4   : > { %1790 = vmatpush3.bf16.msra.mxu0 %v2184_v23  ;;  %v2244_v2 = vld [vmem:[%s2834_s10 + $0x10c] ss:$16 sps:$4 sm:$0xff]   ;;  %v2246_v3 = vld [vmem:[%s2834_s10 + $0x100] ss:$16 sps:$4 sm:$0xff]   ;;  %v2247_v4 = vld [vmem:[%s2834_s10 + $0x108] ss:$16 sps:$4 sm:$0xff]  }
  0xb5   : > { %1902 = vmatpush3.bf16.msra.mxu1 %v2185_v24  ;;  %1791 = vmatprep.subr.bf16.mxu0 %v2186_v25  ;;  %v2248_v5 = vld [vmem:[%s2834_s10 + $0x124] ss:$16 sps:$4 sm:$0xff]   ;;  %v2250_v6 = vld [vmem:[%s2834_s10 + $0x12c] ss:$16 sps:$4 sm:$0xff]   ;;  %v2252_v7 = vld [vmem:[%s2834_s10 + $0x120] ss:$16 sps:$4 sm:$0xff]  }
  0xb6   : > { %1903 = vmatprep.subr.bf16.mxu1 %v2187_v26  ;;  %v2253_v8 = vld [vmem:[%s2834_s10 + $0x128] ss:$16 sps:$4 sm:$0xff]   ;;  %v2254_v9 = vld [vmem:[%s2834_s10 + $0x144] ss:$16 sps:$4 sm:$0xff]   ;;  %v2256_v10 = vld [vmem:[%s2834_s10 + $0x14c] ss:$16 sps:$4 sm:$0xff]  }
  0xb7   : > { %v2258_v11 = vld [vmem:[%s2834_s10 + $0x140] ss:$16 sps:$4 sm:$0xff]   ;;  %v2259_v12 = vld [vmem:[%s2834_s10 + $0x148] ss:$16 sps:$4 sm:$0xff]   ;;  %v2260_v13 = vld [vmem:[%s2834_s10 + $0x164] ss:$16 sps:$4 sm:$0xff]  }
  0xb8   : > { %1792 = vmatpush3.bf16.msra.mxu0 %v2188_v27  ;;  %v2262_v14 = vld [vmem:[%s2834_s10 + $0x16c] ss:$16 sps:$4 sm:$0xff]   ;;  %v2264_v15 = vld [vmem:[%s2834_s10 + $0x160] ss:$16 sps:$4 sm:$0xff]   ;;  %v2265_v16 = vld [vmem:[%s2834_s10 + $0x168] ss:$16 sps:$4 sm:$0xff]  }
  0xb9   : > { %1904 = vmatpush3.bf16.msra.mxu1 %v2189_v28  ;;  %1793 = vmatprep.subr.bf16.mxu0 %v2190_v29  ;;  %v2266_v17 = vld [vmem:[%s2834_s10 + $0x184] ss:$16 sps:$4 sm:$0xff]   ;;  %v2268_v18 = vld [vmem:[%s2834_s10 + $0x18c] ss:$16 sps:$4 sm:$0xff]   ;;  %v2270_v19 = vld [vmem:[%s2834_s10 + $0x180] ss:$16 sps:$4 sm:$0xff]  }
  0xba   : > { %1905 = vmatprep.subr.bf16.mxu1 %v2191_v30  ;;  %v2271_v20 = vld [vmem:[%s2834_s10 + $0x188] ss:$16 sps:$4 sm:$0xff]   ;;  %v2272_v21 = vld [vmem:[%s2834_s10 + $0x1a4] ss:$16 sps:$4 sm:$0xff]   ;;  %v2274_v22 = vld [vmem:[%s2834_s10 + $0x1ac] ss:$16 sps:$4 sm:$0xff]  }
  0xbb   : > { %v2276_v23 = vld [vmem:[%s2834_s10 + $0x1a0] ss:$16 sps:$4 sm:$0xff]   ;;  %v2277_v24 = vld [vmem:[%s2834_s10 + $0x1a8] ss:$16 sps:$4 sm:$0xff]   ;;  %v2278_v25 = vld [vmem:[%s2834_s10 + $0x1c4] ss:$16 sps:$4 sm:$0xff]  }
  0xbc   : > { %1794 = vmatpush3.bf16.msra.mxu0 %v2192_v31  ;;  %v2280_v26 = vld [vmem:[%s2834_s10 + $0x1cc] ss:$16 sps:$4 sm:$0xff]   ;;  %v2282_v27 = vld [vmem:[%s2834_s10 + $0x1c0] ss:$16 sps:$4 sm:$0xff]   ;;  %v2283_v28 = vld [vmem:[%s2834_s10 + $0x1c8] ss:$16 sps:$4 sm:$0xff]  }
  0xbd   : > { %1906 = vmatpush3.bf16.msra.mxu1 %v2193_v32  ;;  %v2284_v29 = vld [vmem:[%s2834_s10 + $0x1e4] ss:$16 sps:$4 sm:$0xff]   ;;  %v2286_v30 = vld [vmem:[%s2834_s10 + $0x1ec] ss:$16 sps:$4 sm:$0xff]   ;;  %v2288_v31 = vld [vmem:[%s2834_s10 + $0x1e0] ss:$16 sps:$4 sm:$0xff]  }
  0xbe   : > { %v2289_v32 = vld [vmem:[%s2834_s10 + $0x1e8] ss:$16 sps:$4 sm:$0xff]  }
  0xbf   : > { %1019 = vmatmul.mubr.bf16.vlgmr.msra.gmra.mrb[0].mxu0 %v2194_v33 }
  0xc0   : > { %1180 = vmatmul.mubr.bf16.vlgmr.msra.gmra.mrb[0].mxu1 %v2197_v35  ;;  %1026 = vmatprep.mubr.bf16.mxu0 %v2200_v37 }
  0xc1   : > { %1187 = vmatprep.mubr.bf16.mxu1 %v2202_v38 }
  0xc7   : > { %1027 = vmatmul.mubr.bf16.gmra.mrb[4].mxu0 %v2204_v39 }
  0xc8   : > { %1188 = vmatmul.mubr.bf16.gmra.mrb[4].mxu1 %v2205_v40  ;;  %1034 = vmatprep.mubr.bf16.mxu0 %v2206_v41 }
  0xc9   : > { %1195 = vmatprep.mubr.bf16.mxu1 %v2208_v42  ;;  %v314_v42 = vld [vmem:[#allocation2] sm:$0xff] }
  0xcf   : > { %1035 = vmatmul.mubr.bf16.gmra.mrb[8].mxu0 %v2210_v43 }
  0xd0   : > { %1196 = vmatmul.mubr.bf16.gmra.mrb[8].mxu1 %v2211_v44  ;;  %1042 = vmatprep.mubr.bf16.mxu0 %v2212_v45 }
  0xd1   : > { %1203 = vmatprep.mubr.bf16.mxu1 %v2214_v46 }
  0xd7   : > { %1043 = vmatmul.mubr.bf16.gmra.mrb[12].mxu0 %v2216_v47  ;;  %v315_v47 = vld [vmem:[#allocation2 + $0x8] sm:$0xff] }
  0xd8   : > { %1204 = vmatmul.mubr.bf16.gmra.mrb[12].mxu1 %v2217_v48  ;;  %1050 = vmatprep.mubr.bf16.mxu0 %v2218_v49 }
  0xd9   : > { %1211 = vmatprep.mubr.bf16.mxu1 %v2220_v50 }
  0xdf   : > { %1051 = vmatmul.mubr.bf16.gmra.mrb[16].mxu0 %v2222_v51 }
  0xe0   : > { %1212 = vmatmul.mubr.bf16.gmra.mrb[16].mxu1 %v2223_v52  ;;  %1058 = vmatprep.mubr.bf16.mxu0 %v2224_v53 }
  0xe1   : > { %1219 = vmatprep.mubr.bf16.mxu1 %v2226_v54 }
  0xe7   : > { %1059 = vmatmul.mubr.bf16.gmra.mrb[20].mxu0 %v2228_v55 }
  0xe8   : > { %1220 = vmatmul.mubr.bf16.gmra.mrb[20].mxu1 %v2229_v56  ;;  %1066 = vmatprep.mubr.bf16.mxu0 %v2230_v57 }
  0xe9   : > { %1227 = vmatprep.mubr.bf16.mxu1 %v2232_v58 }
  0xef   : > { %1067 = vmatmul.mubr.bf16.gmra.mrb[24].mxu0 %v2234_v59 }
  0xf0   : > { %1228 = vmatmul.mubr.bf16.gmra.mrb[24].mxu1 %v2235_v60  ;;  %1074 = vmatprep.mubr.bf16.mxu0 %v2236_v61  ;;  %v316_v60 = vld [vmem:[#allocation2 + $0x10] sm:$0xff] }
  0xf1   : > { %1235 = vmatprep.mubr.bf16.mxu1 %v2238_v62 }
  0xf7   : > { %1075 = vmatmul.mubr.bf16.gmra.mrb[28].mxu0 %v2240_v63 }
  0xf8   : > { %1236 = vmatmul.mubr.bf16.gmra.mrb[28].mxu1 %v2241_v0  ;;  %1082 = vmatprep.mubr.bf16.mxu0 %v2242_v1  ;;  %v317_v1 = vld [vmem:[#allocation2 + $0x18] sm:$0xff] }
  0xf9   : > { %1243 = vmatprep.mubr.bf16.mxu1 %v2244_v2 }
  0xff   : > { %1083 = vmatmul.mubr.bf16.gmra.mrb[32].mxu0 %v2246_v3 }
 0x100   : > { %1244 = vmatmul.mubr.bf16.gmra.mrb[32].mxu1 %v2247_v4  ;;  %1090 = vmatprep.mubr.bf16.mxu0 %v2248_v5 }
 0x101   : > { %1251 = vmatprep.mubr.bf16.mxu1 %v2250_v6 }
 0x107   : > { %1091 = vmatmul.mubr.bf16.gmra.mrb[36].mxu0 %v2252_v7 }
 0x108   : > { %1252 = vmatmul.mubr.bf16.gmra.mrb[36].mxu1 %v2253_v8  ;;  %1098 = vmatprep.mubr.bf16.mxu0 %v2254_v9 }
 0x109   : > { %1259 = vmatprep.mubr.bf16.mxu1 %v2256_v10 }
 0x10f   : > { %1099 = vmatmul.mubr.bf16.gmra.mrb[40].mxu0 %v2258_v11 }
 0x110   : > { %1260 = vmatmul.mubr.bf16.gmra.mrb[40].mxu1 %v2259_v12  ;;  %1106 = vmatprep.mubr.bf16.mxu0 %v2260_v13 }
 0x111   : > { %1267 = vmatprep.mubr.bf16.mxu1 %v2262_v14  ;;  %v318_v14 = vld [vmem:[#allocation2 + $0x20] sm:$0xff] }
 0x117   : > { %1107 = vmatmul.mubr.bf16.gmra.mrb[44].mxu0 %v2264_v15 }
 0x118   : > { %1268 = vmatmul.mubr.bf16.gmra.mrb[44].mxu1 %v2265_v16  ;;  %1114 = vmatprep.mubr.bf16.mxu0 %v2266_v17 }
 0x119   : > { %1275 = vmatprep.mubr.bf16.mxu1 %v2268_v18 }
 0x11f   : > { %1115 = vmatmul.mubr.bf16.gmra.mrb[48].mxu0 %v2270_v19  ;;  %v319_v19 = vld [vmem:[#allocation2 + $0x28] sm:$0xff] }
 0x120   : > { %1276 = vmatmul.mubr.bf16.gmra.mrb[48].mxu1 %v2271_v20  ;;  %1122 = vmatprep.mubr.bf16.mxu0 %v2272_v21 }
 0x121   : > { %1283 = vmatprep.mubr.bf16.mxu1 %v2274_v22 }
 0x127   : > { %1123 = vmatmul.mubr.bf16.gmra.mrb[52].mxu0 %v2276_v23 }
 0x128   : > { %1284 = vmatmul.mubr.bf16.gmra.mrb[52].mxu1 %v2277_v24  ;;  %1130 = vmatprep.mubr.bf16.mxu0 %v2278_v25 }
 0x129   : > { %1291 = vmatprep.mubr.bf16.mxu1 %v2280_v26 }
 0x12f   : > { %1131 = vmatmul.mubr.bf16.gmra.mrb[56].mxu0 %v2282_v27 }
 0x130   : > { %1292 = vmatmul.mubr.bf16.gmra.mrb[56].mxu1 %v2283_v28  ;;  %1138 = vmatprep.mubr.bf16.mxu0 %v2284_v29 }
 0x131   : > { %1299 = vmatprep.mubr.bf16.mxu1 %v2286_v30 }
 0x137   : > { %1139 = vmatmul.mubr.bf16.gmra.mrb[60].mxu0 %v2288_v31 }
 0x138   : > { %1300 = vmatmul.mubr.bf16.gmra.mrb[60].mxu1 %v2289_v32  ;;  %v320_v32 = vld [vmem:[#allocation2 + $0x30] sm:$0xff] }
 0x192   : > { %v1795_v33 = vpop.f32.mrb[0].mxu0 }
 0x193   : > { %v1907_v34 = vpop.f32.mrb[0].mxu1  ;;  %v1796_v35 = vpop.f32.mrb[1].mxu0 }
 0x194   : > { %v1797_v36 = vadd.f32 %v1796_v35, %v1795_v33  ;;  %v1908_v37 = vpop.f32.mrb[1].mxu1  ;;  %v1798_v38 = vpop.f32.mrb[2].mxu0 }
 0x195   : > { %v1909_v39 = vadd.f32 %v1908_v37, %v1907_v34  ;;  %v1910_v40 = vpop.f32.mrb[2].mxu1  ;;  %v1799_v41 = vpop.f32.mrb[3].mxu0  ;;  %v321_v37 = vld [vmem:[#allocation2 + $0x38] sm:$0xff] }
 0x196   : > { %v1800_v43 = vadd.f32 %v1799_v41, %v1798_v38  ;;  %v1911_v44 = vpop.f32.mrb[3].mxu1 }
 0x197   : > { %v1182_v45 = vadd.f32 %v1909_v39, %v1797_v36  ;;  %v1912_v46 = vadd.f32 %v1911_v44, %v1910_v40 }
 0x199   : > { %v1308_v48 = vadd.f32 %v1182_v45, %v314_v42  ;;  %v1185_v49 = vadd.f32 %v1912_v46, %v1800_v43 }
 0x19a   : > { %v1801_v50 = vpop.f32.mrb[4].mxu0 }
 0x19b   : > { %1340 = vst [vmem:[#allocation2] sm:$0xff] %v1308_v48  ;;  %v1309_v51 = vadd.f32 %v1185_v49, %v315_v47  ;;  %v1913_v52 = vpop.f32.mrb[4].mxu1  ;;  %v1802_v53 = vpop.f32.mrb[5].mxu0 }
 0x19c   : > { %v1803_v54 = vadd.f32 %v1802_v53, %v1801_v50  ;;  %v1914_v55 = vpop.f32.mrb[5].mxu1  ;;  %v1804_v56 = vpop.f32.mrb[6].mxu0  ;;  %v322_v50 = vld [vmem:[#allocation2 + $0x40] sm:$0xff] }
 0x19d   : > { %1341 = vst [vmem:[#allocation2 + $0x8] sm:$0xff] %v1309_v51  ;;  %v1915_v57 = vadd.f32 %v1914_v55, %v1913_v52  ;;  %v1916_v58 = vpop.f32.mrb[6].mxu1  ;;  %v1805_v59 = vpop.f32.mrb[7].mxu0  ;;  %v323_v55 = vld [vmem:[#allocation2 + $0x48] sm:$0xff] }
 0x19e   : > { %v1806_v61 = vadd.f32 %v1805_v59, %v1804_v56  ;;  %v1917_v62 = vpop.f32.mrb[7].mxu1 }
 0x19f   : > { %v1190_v63 = vadd.f32 %v1915_v57, %v1803_v54  ;;  %v1918_v0 = vadd.f32 %v1917_v62, %v1916_v58 }
 0x1a1   : > { %v1310_v2 = vadd.f32 %v1190_v63, %v316_v60  ;;  %v1193_v3 = vadd.f32 %v1918_v0, %v1806_v61 }
 0x1a2   : > { %v1807_v4 = vpop.f32.mrb[8].mxu0 }
 0x1a3   : > { %1342 = vst [vmem:[#allocation2 + $0x10] sm:$0xff] %v1310_v2  ;;  %v1311_v5 = vadd.f32 %v1193_v3, %v317_v1  ;;  %v1919_v6 = vpop.f32.mrb[8].mxu1  ;;  %v1808_v7 = vpop.f32.mrb[9].mxu0 }
 0x1a4   : > { %v1809_v8 = vadd.f32 %v1808_v7, %v1807_v4  ;;  %v1920_v9 = vpop.f32.mrb[9].mxu1  ;;  %v1810_v10 = vpop.f32.mrb[10].mxu0  ;;  %v324_v4 = vld [vmem:[#allocation2 + $0x50] sm:$0xff] }
 0x1a5   : > { %1343 = vst [vmem:[#allocation2 + $0x18] sm:$0xff] %v1311_v5  ;;  %v1921_v11 = vadd.f32 %v1920_v9, %v1919_v6  ;;  %v1922_v12 = vpop.f32.mrb[10].mxu1  ;;  %v1811_v13 = vpop.f32.mrb[11].mxu0  ;;  %v325_v9 = vld [vmem:[#allocation2 + $0x58] sm:$0xff] }
 0x1a6   : > { %v1812_v15 = vadd.f32 %v1811_v13, %v1810_v10  ;;  %v1923_v16 = vpop.f32.mrb[11].mxu1 }
 0x1a7   : > { %v1198_v17 = vadd.f32 %v1921_v11, %v1809_v8  ;;  %v1924_v18 = vadd.f32 %v1923_v16, %v1922_v12 }
 0x1a9   : > { %v1312_v20 = vadd.f32 %v1198_v17, %v318_v14  ;;  %v1201_v21 = vadd.f32 %v1924_v18, %v1812_v15 }
 0x1aa   : > { %v1813_v22 = vpop.f32.mrb[12].mxu0 }
 0x1ab   : > { %1344 = vst [vmem:[#allocation2 + $0x20] sm:$0xff] %v1312_v20  ;;  %v1313_v23 = vadd.f32 %v1201_v21, %v319_v19  ;;  %v1925_v24 = vpop.f32.mrb[12].mxu1  ;;  %v1814_v25 = vpop.f32.mrb[13].mxu0 }
 0x1ac   : > { %v1815_v26 = vadd.f32 %v1814_v25, %v1813_v22  ;;  %v1926_v27 = vpop.f32.mrb[13].mxu1  ;;  %v1816_v28 = vpop.f32.mrb[14].mxu0  ;;  %v326_v22 = vld [vmem:[#allocation2 + $0x60] sm:$0xff] }
 0x1ad   : > { %1345 = vst [vmem:[#allocation2 + $0x28] sm:$0xff] %v1313_v23  ;;  %v1927_v29 = vadd.f32 %v1926_v27, %v1925_v24  ;;  %v1928_v30 = vpop.f32.mrb[14].mxu1  ;;  %v1817_v31 = vpop.f32.mrb[15].mxu0  ;;  %v327_v27 = vld [vmem:[#allocation2 + $0x68] sm:$0xff] }
 0x1ae   : > { %v1818_v33 = vadd.f32 %v1817_v31, %v1816_v28  ;;  %v1929_v34 = vpop.f32.mrb[15].mxu1 }
 0x1af   : > { %v1206_v35 = vadd.f32 %v1927_v29, %v1815_v26  ;;  %v1930_v36 = vadd.f32 %v1929_v34, %v1928_v30 }
 0x1b1   : > { %v1314_v38 = vadd.f32 %v1206_v35, %v320_v32  ;;  %v1209_v39 = vadd.f32 %v1930_v36, %v1818_v33 }
 0x1b2   : > { %v1819_v40 = vpop.f32.mrb[16].mxu0 }
 0x1b3   : > { %1346 = vst [vmem:[#allocation2 + $0x30] sm:$0xff] %v1314_v38  ;;  %v1315_v41 = vadd.f32 %v1209_v39, %v321_v37  ;;  %v1931_v42 = vpop.f32.mrb[16].mxu1  ;;  %v1820_v43 = vpop.f32.mrb[17].mxu0 }
 0x1b4   : > { %v1821_v44 = vadd.f32 %v1820_v43, %v1819_v40  ;;  %v1932_v45 = vpop.f32.mrb[17].mxu1  ;;  %v1822_v46 = vpop.f32.mrb[18].mxu0  ;;  %v328_v40 = vld [vmem:[#allocation2 + $0x70] sm:$0xff] }
 0x1b5   : > { %1347 = vst [vmem:[#allocation2 + $0x38] sm:$0xff] %v1315_v41  ;;  %v1933_v47 = vadd.f32 %v1932_v45, %v1931_v42  ;;  %v1934_v48 = vpop.f32.mrb[18].mxu1  ;;  %v1823_v49 = vpop.f32.mrb[19].mxu0  ;;  %v329_v45 = vld [vmem:[#allocation2 + $0x78] sm:$0xff] }
 0x1b6   : > { %v1824_v51 = vadd.f32 %v1823_v49, %v1822_v46  ;;  %v1935_v52 = vpop.f32.mrb[19].mxu1 }
 0x1b7   : > { %v1214_v53 = vadd.f32 %v1933_v47, %v1821_v44  ;;  %v1936_v54 = vadd.f32 %v1935_v52, %v1934_v48 }
 0x1b9   : > { %v1316_v56 = vadd.f32 %v1214_v53, %v322_v50  ;;  %v1217_v57 = vadd.f32 %v1936_v54, %v1824_v51 }
 0x1ba   : > { %v1825_v58 = vpop.f32.mrb[20].mxu0 }
 0x1bb   : > { %1348 = vst [vmem:[#allocation2 + $0x40] sm:$0xff] %v1316_v56  ;;  %v1317_v59 = vadd.f32 %v1217_v57, %v323_v55  ;;  %v1937_v60 = vpop.f32.mrb[20].mxu1  ;;  %v1826_v61 = vpop.f32.mrb[21].mxu0 }
 0x1bc   : > { %v1827_v62 = vadd.f32 %v1826_v61, %v1825_v58  ;;  %v1938_v63 = vpop.f32.mrb[21].mxu1  ;;  %v1828_v0 = vpop.f32.mrb[22].mxu0  ;;  %v330_v58 = vld [vmem:[#allocation2 + $0x80] sm:$0xff] }
 0x1bd   : > { %1349 = vst [vmem:[#allocation2 + $0x48] sm:$0xff] %v1317_v59  ;;  %v1939_v1 = vadd.f32 %v1938_v63, %v1937_v60  ;;  %v1940_v2 = vpop.f32.mrb[22].mxu1  ;;  %v1829_v3 = vpop.f32.mrb[23].mxu0  ;;  %v331_v63 = vld [vmem:[#allocation2 + $0x88] sm:$0xff] }
 0x1be   : > { %v1830_v5 = vadd.f32 %v1829_v3, %v1828_v0  ;;  %v1941_v6 = vpop.f32.mrb[23].mxu1 }
 0x1bf   : > { %v1222_v7 = vadd.f32 %v1939_v1, %v1827_v62  ;;  %v1942_v8 = vadd.f32 %v1941_v6, %v1940_v2 }
 0x1c1   : > { %v1318_v10 = vadd.f32 %v1222_v7, %v324_v4  ;;  %v1225_v11 = vadd.f32 %v1942_v8, %v1830_v5 }
 0x1c2   : > { %v1831_v12 = vpop.f32.mrb[24].mxu0 }
 0x1c3   : > { %1350 = vst [vmem:[#allocation2 + $0x50] sm:$0xff] %v1318_v10  ;;  %v1319_v13 = vadd.f32 %v1225_v11, %v325_v9  ;;  %v1943_v14 = vpop.f32.mrb[24].mxu1  ;;  %v1832_v15 = vpop.f32.mrb[25].mxu0 }
 0x1c4   : > { %v1833_v16 = vadd.f32 %v1832_v15, %v1831_v12  ;;  %v1944_v17 = vpop.f32.mrb[25].mxu1  ;;  %v1834_v18 = vpop.f32.mrb[26].mxu0  ;;  %v332_v12 = vld [vmem:[#allocation2 + $0x90] sm:$0xff] }
 0x1c5   : > { %1351 = vst [vmem:[#allocation2 + $0x58] sm:$0xff] %v1319_v13  ;;  %v1945_v19 = vadd.f32 %v1944_v17, %v1943_v14  ;;  %v1946_v20 = vpop.f32.mrb[26].mxu1  ;;  %v1835_v21 = vpop.f32.mrb[27].mxu0  ;;  %v333_v17 = vld [vmem:[#allocation2 + $0x98] sm:$0xff] }
 0x1c6   : > { %v1836_v23 = vadd.f32 %v1835_v21, %v1834_v18  ;;  %v1947_v24 = vpop.f32.mrb[27].mxu1 }
 0x1c7   : > { %v1230_v25 = vadd.f32 %v1945_v19, %v1833_v16  ;;  %v1948_v26 = vadd.f32 %v1947_v24, %v1946_v20 }
 0x1c9   : > { %v1320_v28 = vadd.f32 %v1230_v25, %v326_v22  ;;  %v1233_v29 = vadd.f32 %v1948_v26, %v1836_v23 }
 0x1ca   : > { %v1837_v30 = vpop.f32.mrb[28].mxu0 }
 0x1cb   : > { %1352 = vst [vmem:[#allocation2 + $0x60] sm:$0xff] %v1320_v28  ;;  %v1321_v31 = vadd.f32 %v1233_v29, %v327_v27  ;;  %v1949_v32 = vpop.f32.mrb[28].mxu1  ;;  %v1838_v33 = vpop.f32.mrb[29].mxu0 }
 0x1cc   : > { %v1839_v34 = vadd.f32 %v1838_v33, %v1837_v30  ;;  %v1950_v35 = vpop.f32.mrb[29].mxu1  ;;  %v1840_v36 = vpop.f32.mrb[30].mxu0  ;;  %v334_v30 = vld [vmem:[#allocation2 + $0xa0] sm:$0xff] }
 0x1cd   : > { %1353 = vst [vmem:[#allocation2 + $0x68] sm:$0xff] %v1321_v31  ;;  %v1951_v37 = vadd.f32 %v1950_v35, %v1949_v32  ;;  %v1952_v38 = vpop.f32.mrb[30].mxu1  ;;  %v1841_v39 = vpop.f32.mrb[31].mxu0  ;;  %v335_v35 = vld [vmem:[#allocation2 + $0xa8] sm:$0xff] }
 0x1ce   : > { %v1842_v41 = vadd.f32 %v1841_v39, %v1840_v36  ;;  %v1953_v42 = vpop.f32.mrb[31].mxu1 }
 0x1cf   : > { %v1238_v43 = vadd.f32 %v1951_v37, %v1839_v34  ;;  %v1954_v44 = vadd.f32 %v1953_v42, %v1952_v38 }
 0x1d1   : > { %v1322_v46 = vadd.f32 %v1238_v43, %v328_v40  ;;  %v1241_v47 = vadd.f32 %v1954_v44, %v1842_v41 }
 0x1d2   : > { %v1843_v48 = vpop.f32.mrb[32].mxu0 }
 0x1d3   : > { %1354 = vst [vmem:[#allocation2 + $0x70] sm:$0xff] %v1322_v46  ;;  %v1323_v49 = vadd.f32 %v1241_v47, %v329_v45  ;;  %v1955_v50 = vpop.f32.mrb[32].mxu1  ;;  %v1844_v51 = vpop.f32.mrb[33].mxu0 }
 0x1d4   : > { %v1845_v52 = vadd.f32 %v1844_v51, %v1843_v48  ;;  %v1956_v53 = vpop.f32.mrb[33].mxu1  ;;  %v1846_v54 = vpop.f32.mrb[34].mxu0  ;;  %v336_v48 = vld [vmem:[#allocation2 + $0xb0] sm:$0xff] }
 0x1d5   : > { %1355 = vst [vmem:[#allocation2 + $0x78] sm:$0xff] %v1323_v49  ;;  %v1957_v55 = vadd.f32 %v1956_v53, %v1955_v50  ;;  %v1958_v56 = vpop.f32.mrb[34].mxu1  ;;  %v1847_v57 = vpop.f32.mrb[35].mxu0  ;;  %v337_v53 = vld [vmem:[#allocation2 + $0xb8] sm:$0xff] }
 0x1d6   : > { %v1848_v59 = vadd.f32 %v1847_v57, %v1846_v54  ;;  %v1959_v60 = vpop.f32.mrb[35].mxu1 }
 0x1d7   : > { %v1246_v61 = vadd.f32 %v1957_v55, %v1845_v52  ;;  %v1960_v62 = vadd.f32 %v1959_v60, %v1958_v56 }
 0x1d9   : > { %v1324_v0 = vadd.f32 %v1246_v61, %v330_v58  ;;  %v1249_v1 = vadd.f32 %v1960_v62, %v1848_v59 }
 0x1da   : > { %v1849_v2 = vpop.f32.mrb[36].mxu0 }
 0x1db   : > { %1356 = vst [vmem:[#allocation2 + $0x80] sm:$0xff] %v1324_v0  ;;  %v1325_v3 = vadd.f32 %v1249_v1, %v331_v63  ;;  %v1961_v4 = vpop.f32.mrb[36].mxu1  ;;  %v1850_v5 = vpop.f32.mrb[37].mxu0 }
 0x1dc   : > { %v1851_v6 = vadd.f32 %v1850_v5, %v1849_v2  ;;  %v1962_v7 = vpop.f32.mrb[37].mxu1  ;;  %v1852_v8 = vpop.f32.mrb[38].mxu0  ;;  %v338_v2 = vld [vmem:[#allocation2 + $0xc0] sm:$0xff] }
 0x1dd   : > { %1357 = vst [vmem:[#allocation2 + $0x88] sm:$0xff] %v1325_v3  ;;  %v1963_v9 = vadd.f32 %v1962_v7, %v1961_v4  ;;  %v1964_v10 = vpop.f32.mrb[38].mxu1  ;;  %v1853_v11 = vpop.f32.mrb[39].mxu0  ;;  %v339_v7 = vld [vmem:[#allocation2 + $0xc8] sm:$0xff] }
 0x1de   : > { %v1854_v13 = vadd.f32 %v1853_v11, %v1852_v8  ;;  %v1965_v14 = vpop.f32.mrb[39].mxu1 }
 0x1df   : > { %v1254_v15 = vadd.f32 %v1963_v9, %v1851_v6  ;;  %v1966_v16 = vadd.f32 %v1965_v14, %v1964_v10 }
 0x1e1   : > { %v1326_v18 = vadd.f32 %v1254_v15, %v332_v12  ;;  %v1257_v19 = vadd.f32 %v1966_v16, %v1854_v13 }
 0x1e2   : > { %v1855_v20 = vpop.f32.mrb[40].mxu0 }
 0x1e3   : > { %1358 = vst [vmem:[#allocation2 + $0x90] sm:$0xff] %v1326_v18  ;;  %v1327_v21 = vadd.f32 %v1257_v19, %v333_v17  ;;  %v1967_v22 = vpop.f32.mrb[40].mxu1  ;;  %v1856_v23 = vpop.f32.mrb[41].mxu0 }
 0x1e4   : > { %v1857_v24 = vadd.f32 %v1856_v23, %v1855_v20  ;;  %v1968_v25 = vpop.f32.mrb[41].mxu1  ;;  %v1858_v26 = vpop.f32.mrb[42].mxu0  ;;  %v340_v20 = vld [vmem:[#allocation2 + $0xd0] sm:$0xff] }
 0x1e5   : > { %1359 = vst [vmem:[#allocation2 + $0x98] sm:$0xff] %v1327_v21  ;;  %v1969_v27 = vadd.f32 %v1968_v25, %v1967_v22  ;;  %v1970_v28 = vpop.f32.mrb[42].mxu1  ;;  %v1859_v29 = vpop.f32.mrb[43].mxu0  ;;  %v341_v25 = vld [vmem:[#allocation2 + $0xd8] sm:$0xff] }
 0x1e6   : > { %v1860_v31 = vadd.f32 %v1859_v29, %v1858_v26  ;;  %v1971_v32 = vpop.f32.mrb[43].mxu1 }
 0x1e7   : > { %v1262_v33 = vadd.f32 %v1969_v27, %v1857_v24  ;;  %v1972_v34 = vadd.f32 %v1971_v32, %v1970_v28 }
 0x1e9   : > { %v1328_v36 = vadd.f32 %v1262_v33, %v334_v30  ;;  %v1265_v37 = vadd.f32 %v1972_v34, %v1860_v31 }
 0x1ea   : > { %v1861_v38 = vpop.f32.mrb[44].mxu0 }
 0x1eb   : > { %1360 = vst [vmem:[#allocation2 + $0xa0] sm:$0xff] %v1328_v36  ;;  %v1329_v39 = vadd.f32 %v1265_v37, %v335_v35  ;;  %v1973_v40 = vpop.f32.mrb[44].mxu1  ;;  %v1862_v41 = vpop.f32.mrb[45].mxu0 }
 0x1ec   : > { %v1863_v42 = vadd.f32 %v1862_v41, %v1861_v38  ;;  %v1974_v43 = vpop.f32.mrb[45].mxu1  ;;  %v1864_v44 = vpop.f32.mrb[46].mxu0  ;;  %v342_v38 = vld [vmem:[#allocation2 + $0xe0] sm:$0xff] }
 0x1ed   : > { %1361 = vst [vmem:[#allocation2 + $0xa8] sm:$0xff] %v1329_v39  ;;  %v1975_v45 = vadd.f32 %v1974_v43, %v1973_v40  ;;  %v1976_v46 = vpop.f32.mrb[46].mxu1  ;;  %v1865_v47 = vpop.f32.mrb[47].mxu0  ;;  %v343_v43 = vld [vmem:[#allocation2 + $0xe8] sm:$0xff] }
 0x1ee   : > { %v1866_v49 = vadd.f32 %v1865_v47, %v1864_v44  ;;  %v1977_v50 = vpop.f32.mrb[47].mxu1 }
 0x1ef   : > { %v1270_v51 = vadd.f32 %v1975_v45, %v1863_v42  ;;  %v1978_v52 = vadd.f32 %v1977_v50, %v1976_v46 }
 0x1f1   : > { %v1330_v54 = vadd.f32 %v1270_v51, %v336_v48  ;;  %v1273_v55 = vadd.f32 %v1978_v52, %v1866_v49 }
 0x1f2   : > { %v1867_v56 = vpop.f32.mrb[48].mxu0 }
 0x1f3   : > { %1362 = vst [vmem:[#allocation2 + $0xb0] sm:$0xff] %v1330_v54  ;;  %v1331_v57 = vadd.f32 %v1273_v55, %v337_v53  ;;  %v1979_v58 = vpop.f32.mrb[48].mxu1  ;;  %v1868_v59 = vpop.f32.mrb[49].mxu0 }
 0x1f4   : > { %v1869_v60 = vadd.f32 %v1868_v59, %v1867_v56  ;;  %v1980_v61 = vpop.f32.mrb[49].mxu1  ;;  %v1870_v62 = vpop.f32.mrb[50].mxu0  ;;  %v344_v56 = vld [vmem:[#allocation2 + $0xf0] sm:$0xff] }
 0x1f5   : > { %1363 = vst [vmem:[#allocation2 + $0xb8] sm:$0xff] %v1331_v57  ;;  %v1981_v63 = vadd.f32 %v1980_v61, %v1979_v58  ;;  %v1982_v0 = vpop.f32.mrb[50].mxu1  ;;  %v1871_v1 = vpop.f32.mrb[51].mxu0  ;;  %v345_v61 = vld [vmem:[#allocation2 + $0xf8] sm:$0xff] }
 0x1f6   : > { %v1872_v3 = vadd.f32 %v1871_v1, %v1870_v62  ;;  %v1983_v4 = vpop.f32.mrb[51].mxu1  ;;  %v1376_v1 = vld [vmem:[#allocation2] sm:$0xff] (!%p1770_p13) }
 0x1f7   : > { %v1278_v5 = vadd.f32 %v1981_v63, %v1869_v60  ;;  %v1984_v6 = vadd.f32 %v1983_v4, %v1982_v0 }
 0x1f9   : > { %v1332_v8 = vadd.f32 %v1278_v5, %v338_v2  ;;  %v1281_v9 = vadd.f32 %v1984_v6, %v1872_v3  ;;  %v2963_v2 = vld [vmem:[%s275_s22] ss:$0 sm:$0xff] (!%p1770_p13)  ;;  %v1377_v3 = vld [vmem:[#allocation2 + $0x8] sm:$0xff] (!%p1770_p13)  ;;  %v1378_v6 = vld [vmem:[#allocation2 + $0x10] sm:$0xff] (!%p1770_p13) }
 0x1fa   : > { %v1873_v10 = vpop.f32.mrb[52].mxu0  ;;  %v1415_v4 = vadd.f32 (!%p1770_p13), %v2963_v2, %v1376_v1  ;;  %v1416_v5 = vadd.f32 (!%p1770_p13), %v2963_v2, %v1377_v3 }
 0x1fb   : > { %1364 = vst [vmem:[#allocation2 + $0xc0] sm:$0xff] %v1332_v8  ;;  %v1333_v11 = vadd.f32 %v1281_v9, %v339_v7  ;;  %v1985_v12 = vpop.f32.mrb[52].mxu1  ;;  %v1874_v13 = vpop.f32.mrb[53].mxu0  ;;  %v1379_v7 = vld [vmem:[#allocation2 + $0x18] sm:$0xff] (!%p1770_p13)  ;;  %v1380_v8 = vld [vmem:[#allocation2 + $0x20] sm:$0xff] (!%p1770_p13)  ;;  %v1417_v9 = vadd.f32 (!%p1770_p13), %v2963_v2, %v1378_v6 }
 0x1fc   : > { %v1875_v14 = vadd.f32 %v1874_v13, %v1873_v10  ;;  %v1986_v15 = vpop.f32.mrb[53].mxu1  ;;  %v1876_v16 = vpop.f32.mrb[54].mxu0  ;;  %v1418_v10 = vadd.f32 (!%p1770_p13), %v2963_v2, %v1379_v7  ;;  %v1382_v13 = vld [vmem:[#allocation2 + $0x30] sm:$0xff] (!%p1770_p13) }
 0x1fd   : > { %1365 = vst [vmem:[#allocation2 + $0xc8] sm:$0xff] %v1333_v11  ;;  %v1987_v17 = vadd.f32 %v1986_v15, %v1985_v12  ;;  %v1988_v18 = vpop.f32.mrb[54].mxu1  ;;  %v1877_v19 = vpop.f32.mrb[55].mxu0  ;;  %v1419_v11 = vadd.f32 (!%p1770_p13), %v2963_v2, %v1380_v8  ;;  %v1381_v12 = vld [vmem:[#allocation2 + $0x28] sm:$0xff] (!%p1770_p13)  ;;  %v1447_v15 = vmax.f32 (!%p1770_p13), %v1415_v4, 0.0 }
 0x1fe   : > { %v1878_v21 = vadd.f32 %v1877_v19, %v1876_v16  ;;  %v1989_v22 = vpop.f32.mrb[55].mxu1  ;;  %v1448_v16 = vmax.f32 (!%p1770_p13), %v1416_v5, 0.0  ;;  %v1384_v19 = vld [vmem:[#allocation2 + $0x40] sm:$0xff] (!%p1770_p13) }
 0x1ff   : > { %v1286_v23 = vadd.f32 %v1987_v17, %v1875_v14  ;;  %v1990_v24 = vadd.f32 %v1989_v22, %v1988_v18  ;;  %v1383_v14 = vld [vmem:[#allocation2 + $0x38] sm:$0xff] (!%p1770_p13)  ;;  %v1420_v17 = vadd.f32 (!%p1770_p13), %v2963_v2, %v1381_v12  ;;  %v1421_v18 = vadd.f32 (!%p1770_p13), %v2963_v2, %v1382_v13  ;;  %1479 = vst [vmem:[%s2858_s21] sm:$0xff] (!%p1770_p13), %v1447_v15 }
 0x200   : > { %v1449_v22 = vmax.f32 (!%p1770_p13), %v1417_v9, 0.0  ;;  %1480 = vst [vmem:[%s2858_s21 + $0x8] sm:$0xff] (!%p1770_p13), %v1448_v16 }
 0x201   : > { %v1334_v26 = vadd.f32 %v1286_v23, %v340_v20  ;;  %v1289_v27 = vadd.f32 %v1990_v24, %v1878_v21  ;;  %v1385_v20 = vld [vmem:[#allocation2 + $0x48] sm:$0xff] (!%p1770_p13)  ;;  %v1386_v21 = vld [vmem:[#allocation2 + $0x50] sm:$0xff] (!%p1770_p13)  ;;  %v1450_v23 = vmax.f32 (!%p1770_p13), %v1418_v10, 0.0  ;;  %v1451_v24 = vmax.f32 (!%p1770_p13), %v1419_v11, 0.0 }
 0x202   : > { %v1879_v28 = vpop.f32.mrb[56].mxu0  ;;  %1481 = vst [vmem:[%s2858_s21 + $0x10] sm:$0xff] (!%p1770_p13), %v1449_v22 }
 0x203   : > { %1366 = vst [vmem:[#allocation2 + $0xd0] sm:$0xff] %v1334_v26  ;;  %v1335_v29 = vadd.f32 %v1289_v27, %v341_v25  ;;  %v1991_v30 = vpop.f32.mrb[56].mxu1  ;;  %v1880_v31 = vpop.f32.mrb[57].mxu0  ;;  %v1422_v25 = vadd.f32 (!%p1770_p13), %v2963_v2, %v1383_v14  ;;  %v1387_v26 = vld [vmem:[#allocation2 + $0x58] sm:$0xff] (!%p1770_p13)  ;;  %v1388_v27 = vld [vmem:[#allocation2 + $0x60] sm:$0xff] (!%p1770_p13)  ;;  %1482 = vst [vmem:[%s2858_s21 + $0x18] sm:$0xff] (!%p1770_p13), %v1450_v23 }
 0x204   : > { %v1881_v32 = vadd.f32 %v1880_v31, %v1879_v28  ;;  %v1992_v33 = vpop.f32.mrb[57].mxu1  ;;  %v1882_v34 = vpop.f32.mrb[58].mxu0  ;;  %v1389_v28 = vld [vmem:[#allocation2 + $0x68] sm:$0xff] (!%p1770_p13)  ;;  %v1423_v31 = vadd.f32 (!%p1770_p13), %v2963_v2, %v1384_v19  ;;  %1483 = vst [vmem:[%s2858_s21 + $0x20] sm:$0xff] (!%p1770_p13), %v1451_v24 }
 0x205   : > { %1367 = vst [vmem:[#allocation2 + $0xd8] sm:$0xff] %v1335_v29  ;;  %v1993_v35 = vadd.f32 %v1992_v33, %v1991_v30  ;;  %v1994_v36 = vpop.f32.mrb[58].mxu1  ;;  %v1883_v37 = vpop.f32.mrb[59].mxu0  ;;  %v1452_v29 = vmax.f32 (!%p1770_p13), %v1420_v17, 0.0  ;;  %v1453_v30 = vmax.f32 (!%p1770_p13), %v1421_v18, 0.0  ;;  %v1390_v33 = vld [vmem:[#allocation2 + $0x70] sm:$0xff] (!%p1770_p13) }
 0x206   : > { %v1884_v39 = vadd.f32 %v1883_v37, %v1882_v34  ;;  %v1995_v40 = vpop.f32.mrb[59].mxu1  ;;  %v1391_v34 = vld [vmem:[#allocation2 + $0x78] sm:$0xff] (!%p1770_p13)  ;;  %v1426_v37 = vadd.f32 (!%p1770_p13), %v2963_v2, %v1387_v26 }
 0x207   : > { %v1294_v41 = vadd.f32 %v1993_v35, %v1881_v32  ;;  %v1996_v42 = vadd.f32 %v1995_v40, %v1994_v36  ;;  %v1424_v32 = vadd.f32 (!%p1770_p13), %v2963_v2, %v1385_v20  ;;  %v1454_v35 = vmax.f32 (!%p1770_p13), %v1422_v25, 0.0  ;;  %v1393_v40 = vld [vmem:[#allocation2 + $0x88] sm:$0xff] (!%p1770_p13)  ;;  %1484 = vst [vmem:[%s2858_s21 + $0x28] sm:$0xff] (!%p1770_p13), %v1452_v29  ;;  %1485 = vst [vmem:[%s2858_s21 + $0x30] sm:$0xff] (!%p1770_p13), %v1453_v30 }
 0x208   : > { %v1425_v36 = vadd.f32 (!%p1770_p13), %v2963_v2, %v1386_v21 }
 0x209   : > { %v1336_v44 = vadd.f32 %v1294_v41, %v342_v38  ;;  %v1297_v45 = vadd.f32 %v1996_v42, %v1884_v39  ;;  %v1427_v38 = vadd.f32 (!%p1770_p13), %v2963_v2, %v1388_v27  ;;  %v1392_v39 = vld [vmem:[#allocation2 + $0x80] sm:$0xff] (!%p1770_p13)  ;;  %v1455_v41 = vmax.f32 (!%p1770_p13), %v1423_v31, 0.0  ;;  %1486 = vst [vmem:[%s2858_s21 + $0x38] sm:$0xff] (!%p1770_p13), %v1454_v35 }
 0x20a   : > { %v1885_v46 = vpop.f32.mrb[60].mxu0  ;;  %v1456_v42 = vmax.f32 (!%p1770_p13), %v1424_v32, 0.0  ;;  %v1402_v6 = vld [vmem:[#allocation2 + $0xd0] sm:$0xff] (!%p1770_p13) }
 0x20b   : > { %1368 = vst [vmem:[#allocation2 + $0xe0] sm:$0xff] %v1336_v44  ;;  %v1337_v47 = vadd.f32 %v1297_v45, %v343_v43  ;;  %v1997_v48 = vpop.f32.mrb[60].mxu1  ;;  %v1886_v49 = vpop.f32.mrb[61].mxu0  ;;  %v1428_v43 = vadd.f32 (!%p1770_p13), %v2963_v2, %v1389_v28  ;;  %v1429_v44 = vadd.f32 (!%p1770_p13), %v2963_v2, %v1390_v33  ;;  %v1394_v45 = vld [vmem:[#allocation2 + $0x90] sm:$0xff] (!%p1770_p13)  ;;  %1487 = vst [vmem:[%s2858_s21 + $0x40] sm:$0xff] (!%p1770_p13), %v1455_v41 }
 0x20c   : > { %v1887_v50 = vadd.f32 %v1886_v49, %v1885_v46  ;;  %v1998_v51 = vpop.f32.mrb[61].mxu1  ;;  %v1888_v52 = vpop.f32.mrb[62].mxu0  ;;  %v1395_v46 = vld [vmem:[#allocation2 + $0x98] sm:$0xff] (!%p1770_p13)  ;;  %v1458_v49 = vmax.f32 (!%p1770_p13), %v1426_v37, 0.0  ;;  %1488 = vst [vmem:[%s2858_s21 + $0x48] sm:$0xff] (!%p1770_p13), %v1456_v42  ;;  %v1441_v21 = vadd.f32 (!%p1770_p13), %v2963_v2, %v1402_v6 }
 0x20d   : > { %1369 = vst [vmem:[#allocation2 + $0xe8] sm:$0xff] %v1337_v47  ;;  %v1999_v53 = vadd.f32 %v1998_v51, %v1997_v48  ;;  %v2000_v54 = vpop.f32.mrb[62].mxu1  ;;  %v1889_v55 = vpop.f32.mrb[63].mxu0  ;;  %v1396_v47 = vld [vmem:[#allocation2 + $0xa0] sm:$0xff] (!%p1770_p13)  ;;  %v1457_v48 = vmax.f32 (!%p1770_p13), %v1425_v36, 0.0  ;;  %v1430_v51 = vadd.f32 (!%p1770_p13), %v2963_v2, %v1391_v34  ;;  %v1403_v7 = vld [vmem:[#allocation2 + $0xd8] sm:$0xff] (!%p1770_p13) }
 0x20e   : > { %v1890_v57 = vadd.f32 %v1889_v55, %v1888_v52  ;;  %v2001_v58 = vpop.f32.mrb[63].mxu1  ;;  %v1397_v52 = vld [vmem:[#allocation2 + $0xa8] sm:$0xff] (!%p1770_p13)  ;;  %v1461_v55 = vmax.f32 (!%p1770_p13), %v1429_v44, 0.0  ;;  %1490 = vst [vmem:[%s2858_s21 + $0x58] sm:$0xff] (!%p1770_p13), %v1458_v49  ;;  %v1442_v22 = vadd.f32 (!%p1770_p13), %v2963_v2, %v1403_v7  ;;  %v1473_v28 = vmax.f32 (!%p1770_p13), %v1441_v21, 0.0 }
 0x20f   : > { %v1302_v59 = vadd.f32 %v1999_v53, %v1887_v50  ;;  %v2002_v60 = vadd.f32 %v2001_v58, %v2000_v54  ;;  %1375 = sbr.rel (%p1770_p13) target bundleno = 546 (0x222), region = 48  ;;  %v1459_v50 = vmax.f32 (!%p1770_p13), %v1427_v38, 0.0  ;;  %v1398_v53 = vld [vmem:[#allocation2 + $0xb0] sm:$0xff] (!%p1770_p13)  ;;  %v1460_v54 = vmax.f32 (!%p1770_p13), %v1428_v43, 0.0  ;;  %v1399_v58 = vld [vmem:[#allocation2 + $0xb8] sm:$0xff] (!%p1770_p13)  ;;  %1489 = vst [vmem:[%s2858_s21 + $0x50] sm:$0xff] (!%p1770_p13), %v1457_v48 }
 0x210   : > { %1493 = vst [vmem:[%s2858_s21 + $0x70] sm:$0xff] (!%p1770_p13), %v1461_v55  ;;  %v1436_v4 = vadd.f32 (!%p1770_p13), %v2963_v2, %v1397_v52  ;;  %v1437_v5 = vadd.f32 (!%p1770_p13), %v2963_v2, %v1398_v53  ;;  %v1438_v12 = vadd.f32 (!%p1770_p13), %v2963_v2, %v1399_v58  ;;  %v1474_v29 = vmax.f32 (!%p1770_p13), %v1442_v22, 0.0  ;;  %1505 = vst [vmem:[%s2858_s21 + $0xd0] sm:$0xff] (!%p1770_p13), %v1473_v28 }
 0x211   : > { %v1338_v62 = vadd.f32 %v1302_v59, %v344_v56  ;;  %v1305_v63 = vadd.f32 %v2002_v60, %v1890_v57  ;;  %v1431_v56 = vadd.f32 (!%p1770_p13), %v2963_v2, %v1392_v39  ;;  %v1432_v57 = vadd.f32 (!%p1770_p13), %v2963_v2, %v1393_v40  ;;  %1491 = vst [vmem:[%s2858_s21 + $0x60] sm:$0xff] (!%p1770_p13), %v1459_v50 }
 0x212   : > { %v1462_v59 = vmax.f32 (!%p1770_p13), %v1430_v51, 0.0  ;;  %v1433_v60 = vadd.f32 (!%p1770_p13), %v2963_v2, %v1394_v45  ;;  %1492 = vst [vmem:[%s2858_s21 + $0x68] sm:$0xff] (!%p1770_p13), %v1460_v54  ;;  %v1404_v8 = vld [vmem:[#allocation2 + $0xe0] sm:$0xff] (!%p1770_p13)  ;;  %v1468_v15 = vmax.f32 (!%p1770_p13), %v1436_v4, 0.0  ;;  %v1469_v16 = vmax.f32 (!%p1770_p13), %v1437_v5, 0.0  ;;  %1506 = vst [vmem:[%s2858_s21 + $0xd8] sm:$0xff] (!%p1770_p13), %v1474_v29 }
 0x213   : > { %1370 = vst [vmem:[#allocation2 + $0xf0] sm:$0xff] %v1338_v62  ;;  %v1339_v0 = vadd.f32 %v1305_v63, %v345_v61  ;;  %v1434_v61 = vadd.f32 (!%p1770_p13), %v2963_v2, %v1395_v46  ;;  %v1435_v62 = vadd.f32 (!%p1770_p13), %v2963_v2, %v1396_v47  ;;  %v1400_v63 = vld [vmem:[#allocation2 + $0xc0] sm:$0xff] (!%p1770_p13)  ;;  %v1463_v1 = vmax.f32 (!%p1770_p13), %v1431_v56, 0.0 }
 0x214   : > { %v1464_v3 = vmax.f32 (!%p1770_p13), %v1432_v57, 0.0  ;;  %1494 = vst [vmem:[%s2858_s21 + $0x78] sm:$0xff] (!%p1770_p13), %v1462_v59  ;;  %v1465_v9 = vmax.f32 (!%p1770_p13), %v1433_v60, 0.0  ;;  %v1405_v13 = vld [vmem:[#allocation2 + $0xe8] sm:$0xff] (!%p1770_p13)  ;;  %v1439_v17 = vadd.f32 (!%p1770_p13), %v2963_v2, %v1400_v63  ;;  %v1470_v20 = vmax.f32 (!%p1770_p13), %v1438_v12, 0.0  ;;  %1500 = vst [vmem:[%s2858_s21 + $0xa8] sm:$0xff] (!%p1770_p13), %v1468_v15 }
 0x215   : > { %1371 = vst [vmem:[#allocation2 + $0xf8] sm:$0xff] %v1339_v0  ;;  %v1401_v0 = vld [vmem:[#allocation2 + $0xc8] sm:$0xff] (!%p1770_p13)  ;;  %v1466_v10 = vmax.f32 (!%p1770_p13), %v1434_v61, 0.0  ;;  %v1467_v11 = vmax.f32 (!%p1770_p13), %v1435_v62, 0.0  ;;  %1495 = vst [vmem:[%s2858_s21 + $0x80] sm:$0xff] (!%p1770_p13), %v1463_v1  ;;  %v1443_v23 = vadd.f32 (!%p1770_p13), %v2963_v2, %v1404_v8  ;;  %v1444_v26 = vadd.f32 (!%p1770_p13), %v2963_v2, %v1405_v13 }
 0x216   : > { %1496 = vst [vmem:[%s2858_s21 + $0x88] sm:$0xff] %v1464_v3  ;;  %v1440_v18 = vadd.f32 %v2963_v2, %v1401_v0  ;;  %1497 = vst [vmem:[%s2858_s21 + $0x90] sm:$0xff] %v1465_v9  ;;  %v1471_v24 = vmax.f32 %v1439_v17, 0.0 }
 0x217   : > { %1498 = vst [vmem:[%s2858_s21 + $0x98] sm:$0xff] %v1466_v10  ;;  %1499 = vst [vmem:[%s2858_s21 + $0xa0] sm:$0xff] %v1467_v11  ;;  %v1475_v30 = vmax.f32 %v1443_v23, 0.0  ;;  %v1476_v32 = vmax.f32 %v1444_v26, 0.0 }
 0x218   : > { %1501 = vst [vmem:[%s2858_s21 + $0xb0] sm:$0xff] %v1469_v16  ;;  %v1472_v25 = vmax.f32 %v1440_v18, 0.0  ;;  %1502 = vst [vmem:[%s2858_s21 + $0xb8] sm:$0xff] %v1470_v20 }
 0x219   : > { %1503 = vst [vmem:[%s2858_s21 + $0xc0] sm:$0xff] %v1471_v24  ;;  %1507 = vst [vmem:[%s2858_s21 + $0xe0] sm:$0xff] %v1475_v30 }
 0x21a   : > { %v1406_v14 = vld [vmem:[#allocation2 + $0xf0] sm:$0xff]  ;;  %1504 = vst [vmem:[%s2858_s21 + $0xc8] sm:$0xff] %v1472_v25  ;;  %1508 = vst [vmem:[%s2858_s21 + $0xe8] sm:$0xff] %v1476_v32 }
 0x21b   : > { %v1445_v27 = vadd.f32 %v2963_v2, %v1406_v14 }
 0x21c   : > { %v1407_v19 = vld [vmem:[#allocation2 + $0xf8] sm:$0xff] }
 0x21d   : > { %v1446_v31 = vadd.f32 %v2963_v2, %v1407_v19  ;;  %v1477_v33 = vmax.f32 %v1445_v27, 0.0 }
 0x21f   : > { %v1478_v34 = vmax.f32 %v1446_v31, 0.0  ;;  %1509 = vst [vmem:[%s2858_s21 + $0xf0] sm:$0xff] %v1477_v33 }
 0x221   : > { %1510 = vst [vmem:[%s2858_s21 + $0xf8] sm:$0xff] %v1478_v34 }
 0x222 PF: > { %s3181_s6 = sld [smem:[#allocation14_spill]]  ;;  %s3182_s18 = sld [smem:[#allocation13_spill]] }
 0x223   : > { %s1527_s4 = sshll.u32 %s2858_s21, 4  ;;  %s3183_s22 = sld [smem:[#allocation23_spill]]  ;;  %s3032_s4 = int_to_ptr.vmem [resolvable:$true] %s1527_s4 }
 0x224   : > { %s3041_s0 = scalar_lea.sflag [#allocation5], %s267_s26  ;;  %s2350_s10 = scalar_lea.vmem %s3032_s4, 4096 }
 0x225   : > { %p2351_p3 = scmp.ne.s32.totalorder %s3032_s4, %s2350_s10  ;;  %p3185_p2 = scmp.ne.s32.totalorder %s3168_s7, 0 }
 0x226   : > { %s2527_s21 = smov [#allocation8]  }
 0x227   : > { %p2352_p9 = pnand %p2351_p3, %p3185_p2  ;;  %s2354_s30 = sshll.u32 %s2527_s21, 4  ;;  %s2355_s30 = int_to_ptr.vmem [resolvable:$false] %s2354_s30 }
 0x228   : > { %s2004_s23 = smul.u32 96, %s3181_s6  ;;  %s2356_s6 = scalar_lea.vmem %s2355_s30, 8192 }
 0x229   : > { %s3184_s5 = smov %s3183_s22  ;;  %p2353_p0 = pneg %p2352_p9 }
 0x22a   : > { %s1524_s2 = sadd.s32 %s3182_s18, %s2004_s23  ;;  %p2357_p1 = scmp.lt.s32.totalorder %s3032_s4, %s2355_s30 }
 0x22b   : > { %s1775_s3 = sshll.u32 %s1524_s2, 7  ;;  %p2358_p5 = scmp.lt.s32.totalorder %s2356_s6, %s2350_s10 }
 0x22c   : > { %s3037_s29 = scalar_lea.hbm %s3183_s22, %s1775_s3 }
 0x22d   : > { %p2359_p6 = por %p2358_p5, %p2357_p1 }
 0x22f   : > { %p2360_p8 = pnand %p2359_p6, %p2353_p0 }
 0x231   : > { %2363 = shalt.err (!%p2360_p8)
}
 0x232   : > { %s2364_s26 = scalar_lea.hbm %s3037_s29, 4096  ;;  %s2368_s2 = scalar_lea.hbm %s3184_s5, 24576 }
 0x233   : > { %p2365_p10 = scmp.ne.s32.totalorder %s3037_s29, %s2364_s26  ;;  %p2369_p4 = scmp.lt.u32.totalorder %s3037_s29, %s3184_s5 }
 0x234   : > { %p2370_p12 = scmp.lt.u32.totalorder %s2368_s2, %s2364_s26  ;;  %p2372_p3 = scmp.lt.u32.totalorder %s2364_s26, %s3037_s29 }
 0x235   : > { %p2366_p11 = pnand %p2365_p10, %p3185_p2 }
 0x236   : > { %p2371_p13 = por %p2370_p12, %p2369_p4 }
 0x237   : > { %p2367_p7 = pneg %p2366_p11 }
 0x238   : > { %p2373_p9 = por %p2372_p3, %p2371_p13 }
 0x23a   : > { %p2374_p0 = pnand %p2373_p9, %p2367_p7 }
 0x23c   : > { %2377 = shalt.err (!%p2374_p0)
}
 0x23d   : > { %s2528_s28 = smov 128   ;;  %s2529_s22 = smov 384  }
 0x23e   : > { %s2530_s10 = smov 8  }
 0x23f   : > { %2009 = dma.vmem_to_hbm [thread:$0]  (%p3185_p2), %s3032_s4, 4096, %s3037_s29, %s3041_s0, %s2528_s28, %s2529_s22, %s2530_s10  }
 0x240 PF: > { %p2023_p1 = scmp.ge.s32.totalorder %s2516_s27, 2  ;;  %s1542_s21 = sand.u32 1, %s2456_s12  }
 0x241   : > { %p3186_p5 = scmp.ne.s32.totalorder %s3170_s9, 0  ;;  %s1543_s30 = scalar_lea.sflag [#allocation5], %s1542_s21 }
 0x243   : > { %p2019_p6 = pnand %p2023_p1, %p3186_p5 }
 0x245   : > { %2451 = dma.done.wait (!%p2019_p6), %s1543_s30, 4096  }
 0x246   : > { %2453 = vsyncadd (!%p2019_p6), %s1543_s30, 4294963200  ;;  %s22_s27 = sadd.s32 1, %s2516_s27   ;;  %s3188_s7 = sld [smem:[#allocation20_spill]] }
 0x247   : > { %p3070_p8 = scmp.ge.s32.totalorder %s22_s27, 14   ;;  %s3189_s4 = smov %s2776_s15 }
 0x248   : > { %s3190_s23 = sld [smem:[#allocation15_spill]]  ;;  %s3191_s9 = sld [smem:[#allocation16_spill]] }
 0x249   : > { %s3192_s29 = sld [smem:[#allocation18_spill]]  ;;  %s3193_s26 = sld [smem:[#allocation19_spill]] }
 0x24a   : > { %s3194_s12 = smov %s2460_s13  ;;  %s3195_s13 = smov %s2464_s14 }
 0x24b   : > { %s3196_s14 = smov %s2779_s11  ;;  %s3197_s15 = smov %s2472_s16 }
 0x24c   : > { %s3198_s16 = smov %s2476_s17  ;;  %s3199_s17 = smov %s3188_s7 }
 0x24d   : > { %s3200_s18 = smov %s2484_s19  ;;  %s3201_s19 = smov %s2488_s20 }
 0x24e   : > { %s3202_s20 = smov %s3189_s4  ;;  %s3203_s21 = smov %s2504_s24 }
 0x24f   : > { %s3204_s22 = smov %s2508_s25  ;;  %s3205_s24 = smov %s3191_s9 }
 0x250   : > { %s3206_s25 = smov %s3192_s29  ;;  %21 = sbr.rel (!%p3070_p8) target bundleno = 17 (0x11), region = 101 }
 0x257   :  { %1548 = vsyncpa [#allocation4], 1 }
 0x258   :  { %1550 = vsyncpa [#allocation4 + $0x1], 1 }
 0x259   :  { %1551 = vsyncpa [#allocation7], 1 }
 0x25a   :  { %1553 = vsyncpa [#allocation7 + $0x1], 1 }
 0x25b   :  { %1554 = vsyncpa [#allocation5], 1 }
 0x25c   :  { %1556 = vsyncpa [#allocation5 + $0x1], 1 }

</bundles_post_ra>
